<compile_context>
chip_gen: v7x
topology: tpu7x:2x2x1
jax: 0.10.0
libtpu: 0.0.40
codegen_flags: <defaults>
</compile_context>

<pallas_src>
import math
import jax
import jax.numpy as jnp
from jax.experimental import pallas as pl
from jax.experimental.pallas import tpu as pltpu

IN_FEATURES = 28 * 28      # 784
HIDDEN = 1000
HIDDEN_PAD = 1024          # fc1-N / fc2-K padded to a 128-lane multiple
OUT_FEATURES = 10
MAX_TB = 1024              # batch-tile cap (was 512)


def mlp_kernel(x_ref, w1_ref, b1_ref, w2_ref, b2_ref, o_ref):
    # fc1: bf16 MXU inputs, f32 accumulation; bias/ReLU in f32 on the VPU.
    x = x_ref[...].astype(jnp.bfloat16)                                   # (TB, 784)
    h = jnp.dot(x, w1_ref[...], preferred_element_type=jnp.float32)       # (TB, 1024) f32
    h = jnp.maximum(h + b1_ref[...], 0.0)
    # fc2: cast activations to bf16 only at the MXU input, accumulate f32.
    logits = jnp.dot(h.astype(jnp.bfloat16), w2_ref[...],
                     preferred_element_type=jnp.float32)                  # (TB, 10) f32
    logits = logits + b2_ref[...]
    # Numerically stable log_softmax (f32; EUP exp/log, XLU reduce).
    m = jnp.max(logits, axis=-1, keepdims=True)
    s = logits - m
    lse = jnp.log(jnp.sum(jnp.exp(s), axis=-1, keepdims=True))
    o_ref[...] = (s - lse).astype(o_ref.dtype)


def init_params(key):
    """Init matching Layer.init_params: U(-1/sqrt(in), 1/sqrt(in)).

    One-time layout/dtype prep (hoisted out of the forward path):
      - weights transposed to (in, out), stored bf16
      - hidden dim zero-padded 1000 -> 1024 (zero w1 cols, zero b1 entries,
        zero w2 rows) so padded activations are exactly 0 after ReLU and
        contribute nothing to fc2 -> numerically identical to unpadded.
    """
    k1, k2, k3, k4 = jax.random.split(key, 4)
    s1 = 1.0 / math.sqrt(IN_FEATURES)
    s2 = 1.0 / math.sqrt(HIDDEN)
    w1 = jax.random.uniform(k1, (HIDDEN, IN_FEATURES), jnp.float32, -s1, s1)
    b1 = jax.random.uniform(k2, (HIDDEN,), jnp.float32, -s1, s1)
    w2 = jax.random.uniform(k3, (OUT_FEATURES, HIDDEN), jnp.float32, -s2, s2)
    b2 = jax.random.uniform(k4, (OUT_FEATURES,), jnp.float32, -s2, s2)

    w1t = jnp.zeros((IN_FEATURES, HIDDEN_PAD), jnp.bfloat16)
    w1t = w1t.at[:, :HIDDEN].set(w1.T.astype(jnp.bfloat16))            # (784, 1024) bf16
    b1p = jnp.zeros((1, HIDDEN_PAD), jnp.float32).at[:, :HIDDEN].set(b1)
    w2t = jnp.zeros((HIDDEN_PAD, OUT_FEATURES), jnp.bfloat16)
    w2t = w2t.at[:HIDDEN, :].set(w2.T.astype(jnp.bfloat16))            # (1024, 10) bf16
    return (w1t, b1p, w2t, b2.reshape(1, OUT_FEATURES))


def _choose_batch_tile(B):
    """Pick the batch tile.

    - tiny batches: single full-batch tile (full-dim block is always legal)
    - 128 < B <= 2*MAX_TB: split into >=2 tiles (multiple of 8) so the
      "parallel" axis shards across v7x's two TensorCores
    - huge batches: MAX_TB (>= 3 grid steps, both TCs busy anyway)
    """
    if B <= 128:
        return B
    if B <= 2 * MAX_TB:
        half = -(-B // 2)                      # cdiv(B, 2)
        return min(((half + 7) // 8) * 8, MAX_TB)
    return MAX_TB


def model_cl_forward(x, params):
    """x: any shape with B*784 elements (e.g. (B,1,28,28)); params from init_params."""
    w1t, b1, w2t, b2 = params
    B = x.size // IN_FEATURES
    assert B * IN_FEATURES == x.size, "input size must be a multiple of 784"
    xf = x.reshape(B, IN_FEATURES)
    if xf.dtype != jnp.bfloat16:
        # stream f32 and cast in-kernel; bf16 inputs are passed straight through
        xf = xf.astype(jnp.float32)

    tb = _choose_batch_tile(B)
    grid = (pl.cdiv(B, tb),)

    x_bytes = B * IN_FEATURES * xf.dtype.itemsize
    cost = pl.CostEstimate(
        flops=2 * B * IN_FEATURES * HIDDEN_PAD + 2 * B * HIDDEN_PAD * OUT_FEATURES,
        transcendentals=B * (OUT_FEATURES + 1),
        bytes_accessed=(IN_FEATURES * HIDDEN_PAD + HIDDEN_PAD * OUT_FEATURES) * 2  # bf16 weights
                       + (HIDDEN_PAD + OUT_FEATURES) * 4                            # f32 biases
                       + x_bytes + B * OUT_FEATURES * 4,                             # x + out
    )

    return pl.pallas_call(
        mlp_kernel,
        out_shape=jax.ShapeDtypeStruct((B, OUT_FEATURES), jnp.float32),
        grid=grid,
        in_specs=[
            pl.BlockSpec((tb, IN_FEATURES), lambda i: (i, 0)),        # x: follows batch
            pl.BlockSpec((IN_FEATURES, HIDDEN_PAD), lambda i: (0, 0)),# w1: VMEM-resident
            pl.BlockSpec((1, HIDDEN_PAD), lambda i: (0, 0)),          # b1
            pl.BlockSpec((HIDDEN_PAD, OUT_FEATURES), lambda i: (0, 0)),# w2
            pl.BlockSpec((1, OUT_FEATURES), lambda i: (0, 0)),        # b2
        ],
        out_specs=pl.BlockSpec((tb, OUT_FEATURES), lambda i: (i, 0)),
        compiler_params=pltpu.CompilerParams(
            dimension_semantics=("parallel",),
            vmem_limit_bytes=48 * 1024 * 1024,   # TB=1024 footprint ~18-20 MiB; <64 MiB v7x
        ),
        cost_estimate=cost,
    )(xf, w1t, b1, w2t, b2)


def _reference(x, params):
    """Pure-JAX reference applying the same bf16 quantization as the kernel."""
    w1t, b1, w2t, b2 = params
    B = x.size // IN_FEATURES
    xf = x.reshape(B, IN_FEATURES).astype(jnp.float32)
    xq = xf.astype(jnp.bfloat16).astype(jnp.float32)
    h = jnp.maximum(xq @ w1t.astype(jnp.float32) + b1, 0.0)
    hq = h.astype(jnp.bfloat16).astype(jnp.float32)
    logits = hq @ w2t.astype(jnp.float32) + b2
    return jax.nn.log_softmax(logits, axis=-1)


if __name__ == "__main__":
    key = jax.random.PRNGKey(0)
    kx, kp, kx2 = jax.random.split(key, 3)
    params = init_params(kp)

    # MNIST-like small batch: (B, C, H, W) = (8, 1, 28, 28) -> single-tile path.
    x = jax.random.normal(kx, (8, 1, 28, 28), dtype=jnp.float32)
    out = jax.block_until_ready(model_cl_forward(x, params))
    ref = _reference(x, params)
    assert out.shape == (8, 10)
    assert jnp.allclose(out, ref, atol=1e-3, rtol=1e-3), (
        float(jnp.max(jnp.abs(out - ref))))

    # Multi-tile path (exercises the 2-tile v7x split and the masked tail tile).
    x2 = jax.random.normal(kx2, (200, 1, 28, 28), dtype=jnp.float32)
    out2 = jax.block_until_ready(model_cl_forward(x2, params))
    ref2 = _reference(x2, params)
    assert out2.shape == (200, 10)
    assert jnp.allclose(out2, ref2, atol=1e-3, rtol=1e-3), (
        float(jnp.max(jnp.abs(out2 - ref2))))

    print("KERNEL_OK")
</pallas_src>

<mosaic_0001>
module attributes {stable_mosaic.version = 11 : i64} {
  func.func @mlp_kernel(%arg0: i32, %arg1: memref<8x784xf32, #tpu.memory_space<vmem>>, %arg2: memref<784x1024xbf16, #tpu.memory_space<vmem>>, %arg3: memref<1x1024xf32, #tpu.memory_space<vmem>>, %arg4: memref<1024x10xbf16, #tpu.memory_space<vmem>>, %arg5: memref<1x10xf32, #tpu.memory_space<vmem>>, %arg6: memref<8x10xf32, #tpu.memory_space<vmem>>) attributes {dimension_semantics = [#tpu.dimension_semantics<parallel>], iteration_bounds = array<i64: 1>, scalar_prefetch = 0 : i64, scratch_operands = 0 : i64, tpu.core_type = #tpu.core_type<tc>, window_params = [{transform_indices = @transform_0, window_bounds = array<i64: 8, 784>}, {pipeline_mode = #tpu.pipeline_mode<synchronous>, transform_indices = @transform_1, window_bounds = array<i64: 784, 1024>}, {pipeline_mode = #tpu.pipeline_mode<synchronous>, transform_indices = @transform_2, window_bounds = array<i64: 1, 1024>}, {pipeline_mode = #tpu.pipeline_mode<synchronous>, transform_indices = @transform_3, window_bounds = array<i64: 1024, 10>}, {pipeline_mode = #tpu.pipeline_mode<synchronous>, transform_indices = @transform_4, window_bounds = array<i64: 1, 10>}, {transform_indices = @transform_5, window_bounds = array<i64: 8, 10>}]} {
    %c0 = arith.constant 0 : index
    %c0_0 = arith.constant 0 : index
    %0 = vector.load %arg1[%c0, %c0_0] : memref<8x784xf32, #tpu.memory_space<vmem>>, vector<8x784xf32>
    %1 = arith.truncf %0 : vector<8x784xf32> to vector<8x784xbf16>
    %c0_1 = arith.constant 0 : index
    %c0_2 = arith.constant 0 : index
    %2 = vector.load %arg2[%c0_1, %c0_2] : memref<784x1024xbf16, #tpu.memory_space<vmem>>, vector<784x1024xbf16>
    %cst = arith.constant dense<0.000000e+00> : vector<8x1024xf32>
    %3 = tpu.matmul %1, %2, %cst {dimension_numbers = #tpu.dot_dimension_numbers<[1], [0], [0], [1], [0, 0, 1, 1], [], []>} : vector<8x784xbf16>, vector<784x1024xbf16>, vector<8x1024xf32> -> vector<8x1024xf32>
    %c0_3 = arith.constant 0 : index
    %c0_4 = arith.constant 0 : index
    %4 = vector.load %arg3[%c0_3, %c0_4] : memref<1x1024xf32, #tpu.memory_space<vmem>>, vector<1x1024xf32>
    %5 = vector.broadcast %4 : vector<1x1024xf32> to vector<8x1024xf32>
    %6 = arith.addf %3, %5 : vector<8x1024xf32>
    %cst_5 = arith.constant 0.000000e+00 : f32
    %7 = vector.broadcast %cst_5 : f32 to vector<8x1024xf32>
    %8 = arith.maximumf %6, %7 : vector<8x1024xf32>
    %9 = arith.truncf %8 : vector<8x1024xf32> to vector<8x1024xbf16>
    %c0_6 = arith.constant 0 : index
    %c0_7 = arith.constant 0 : index
    %10 = vector.load %arg4[%c0_6, %c0_7] : memref<1024x10xbf16, #tpu.memory_space<vmem>>, vector<1024x10xbf16>
    %cst_8 = arith.constant dense<0.000000e+00> : vector<8x10xf32>
    %11 = tpu.matmul %9, %10, %cst_8 {dimension_numbers = #tpu.dot_dimension_numbers<[1], [0], [0], [1], [0, 0, 1, 1], [], []>} : vector<8x1024xbf16>, vector<1024x10xbf16>, vector<8x10xf32> -> vector<8x10xf32>
    %c0_9 = arith.constant 0 : index
    %c0_10 = arith.constant 0 : index
    %12 = vector.load %arg5[%c0_9, %c0_10] : memref<1x10xf32, #tpu.memory_space<vmem>>, vector<1x10xf32>
    %13 = vector.broadcast %12 : vector<1x10xf32> to vector<8x10xf32>
    %14 = arith.addf %11, %13 : vector<8x10xf32>
    %cst_11 = arith.constant dense<0xFF800000> : vector<8xf32>
    %15 = vector.multi_reduction <maximumf>, %14, %cst_11 [1] : vector<8x10xf32> to vector<8xf32>
    %16 = vector.shape_cast %15 : vector<8xf32> to vector<8x1xf32>
    %17 = vector.broadcast %16 : vector<8x1xf32> to vector<8x10xf32>
    %18 = arith.subf %14, %17 : vector<8x10xf32>
    %19 = math.exp %18 : vector<8x10xf32>
    %cst_12 = arith.constant dense<0.000000e+00> : vector<8xf32>
    %20 = vector.multi_reduction <add>, %19, %cst_12 [1] : vector<8x10xf32> to vector<8xf32>
    %21 = vector.shape_cast %20 : vector<8xf32> to vector<8x1xf32>
    %22 = math.log %21 : vector<8x1xf32>
    %23 = vector.broadcast %22 : vector<8x1xf32> to vector<8x10xf32>
    %24 = arith.subf %18, %23 : vector<8x10xf32>
    %c0_13 = arith.constant 0 : index
    %c0_14 = arith.constant 0 : index
    %25 = vector.load %arg6[%c0_13, %c0_14] : memref<8x10xf32, #tpu.memory_space<vmem>>, vector<8x10xf32>
    tpu.vector_store %arg6[%c0_13, %c0_14], %24 {strides = array<i32>} : memref<8x10xf32, #tpu.memory_space<vmem>>, vector<8x10xf32>,
    return
  }
  func.func @transform_0(%arg0: i32) -> (i32, i32) {
    %c0_i32 = arith.constant 0 : i32
    %c0_i32_0 = arith.constant 0 : i32
    return %arg0, %c0_i32 : i32, i32
  }
  func.func @transform_1(%arg0: i32) -> (i32, i32) {
    %c0_i32 = arith.constant 0 : i32
    %c0_i32_0 = arith.constant 0 : i32
    %c0_i32_1 = arith.constant 0 : i32
    return %c0_i32, %c0_i32_0 : i32, i32
  }
  func.func @transform_2(%arg0: i32) -> (i32, i32) {
    %c0_i32 = arith.constant 0 : i32
    %c0_i32_0 = arith.constant 0 : i32
    %c0_i32_1 = arith.constant 0 : i32
    return %c0_i32, %c0_i32_0 : i32, i32
  }
  func.func @transform_3(%arg0: i32) -> (i32, i32) {
    %c0_i32 = arith.constant 0 : i32
    %c0_i32_0 = arith.constant 0 : i32
    %c0_i32_1 = arith.constant 0 : i32
    return %c0_i32, %c0_i32_0 : i32, i32
  }
  func.func @transform_4(%arg0: i32) -> (i32, i32) {
    %c0_i32 = arith.constant 0 : i32
    %c0_i32_0 = arith.constant 0 : i32
    %c0_i32_1 = arith.constant 0 : i32
    return %c0_i32, %c0_i32_0 : i32, i32
  }
  func.func @transform_5(%arg0: i32) -> (i32, i32) {
    %c0_i32 = arith.constant 0 : i32
    %c0_i32_0 = arith.constant 0 : i32
    return %arg0, %c0_i32 : i32, i32
  }
}

</mosaic_0001>

<bundles_post_ra>
// kernel: tpu_custom_call.1
= control target key start
LH: loop header
LB: loop body
LE: loop exit
PB: predicated region body
PF: predicated region fallthrough
CT: control target
= control target key end

     0   :  { %10 = vsyncpa [#allocation3], 0  ;;  %s5027_s0 = inlined_call_operand.hbm [shape: f32[8,784], index: 0, kind: input, shape index: {}]   ;;  %s5028_s1 = inlined_call_operand.hbm [shape: bf16[784,1024], index: 1, kind: input, shape index: {}]   ;;  %s5029_s2 = inlined_call_operand.hbm [shape: f32[1,1024], index: 2, kind: input, shape index: {}]   ;;  %s5030_s3 = inlined_call_operand.vmem [shape: bf16[1024,10], index: 3, kind: input, shape index: {}]   ;;  %s5031_s4 = inlined_call_operand.hbm [shape: f32[1,10], index: 4, kind: input, shape index: {}]   ;;  %s5032_s5 = inlined_call_operand.hbm [shape: f32[8,10], index: 5, kind: output, shape index: {}]  }
   0x1   :  { %11 = vsyncpa [#allocation6], 0 }
   0x2   :  { %12 = vsyncpa [#allocation9], 0 }
   0x3   :  { %13 = vsyncpa [#allocation4], 0  ;;  %s4664_s18 = smov [#allocation5]   ;;  %s4546_s22 = scalar_lea.hbm %s5028_s1, 50176 }
   0x4   :  { %s29_s19 = sshll.u32 %s4664_s18, 4  ;;  %p4547_p0 = scmp.ne.s32.totalorder %s5028_s1, %s4546_s22  ;;  %s30_s19 = int_to_ptr.vmem [resolvable:$true] %s29_s19 }
   0x5   :  { %p4550_p1 = scmp.lt.u32.totalorder %s4546_s22, %s5028_s1 }
   0x7   :  { %p4552_p2 = pnand %p4550_p1, %p4547_p0 }
   0x9   :  { %4555 = shalt.err (!%p4552_p2)
}
   0xa   :  { %s4556_s27 = scalar_lea.vmem %s30_s19, 50176  ;;  %p4561_p4 = scmp.lt.s32.totalorder %s30_s19, %s30_s19 }
   0xb   :  { %p4557_p3 = scmp.ne.s32.totalorder %s30_s19, %s4556_s27  ;;  %p4562_p5 = scmp.lt.s32.totalorder %s4556_s27, %s4556_s27 }
   0xd   :  { %p4563_p6 = por %p4562_p5, %p4561_p4 }
   0xf   :  { %p4564_p7 = pnand %p4563_p6, %p4557_p3 }
  0x11   :  { %4567 = shalt.err (!%p4564_p7)
}
  0x12   :  { %s4665_s28 = smov 512   ;;  %s4666_s29 = smov 32  }
  0x13   :  { %35 = dma.hbm_to_vmem [thread:$0]  %s5028_s1, 50176, %s30_s19, [#allocation6], %s4665_s28, %s4665_s28, %s4666_s29  }
  0x14   :  { %s4667_s7 = smov [#allocation2]   ;;  %s4668_s9 = smov [#allocation7]  }
  0x15   :  { %s20_s8 = sshll.u32 %s4667_s7, 4  ;;  %s42_s10 = sshll.u32 %s4668_s9, 4  ;;  %s21_s8 = int_to_ptr.vmem [resolvable:$true] %s20_s8  ;;  %s43_s10 = int_to_ptr.vmem [resolvable:$true] %s42_s10 }
  0x16   :  { %s4568_s13 = scalar_lea.hbm %s5027_s0, 896 }
  0x17   :  { %p4569_p8 = scmp.ne.s32.totalorder %s5027_s0, %s4568_s13  ;;  %p4572_p9 = scmp.lt.u32.totalorder %s4568_s13, %s5027_s0 }
  0x19   :  { %p4574_p10 = pnand %p4572_p9, %p4569_p8 }
  0x1b   :  { %4577 = shalt.err (!%p4574_p10)
}
  0x1c   :  { %s4578_s1 = scalar_lea.vmem %s21_s8, 896  ;;  %p4583_p12 = scmp.lt.s32.totalorder %s21_s8, %s21_s8 }
  0x1d   :  { %p4579_p11 = scmp.ne.s32.totalorder %s21_s8, %s4578_s1  ;;  %p4584_p13 = scmp.lt.s32.totalorder %s4578_s1, %s4578_s1 }
  0x1f   :  { %p4585_p0 = por %p4584_p13, %p4583_p12 }
  0x21   :  { %p4586_p1 = pnand %p4585_p0, %p4579_p11 }
  0x23   :  { %4589 = shalt.err (!%p4586_p1)
}
  0x24   :  { %23 = dma.hbm_to_vmem [thread:$0]  %s5027_s0, 896, %s21_s8, [#allocation3]  }
  0x25   :  { %s4590_s22 = scalar_lea.hbm %s5029_s2, 128 }
  0x26   :  { %p4591_p2 = scmp.ne.s32.totalorder %s5029_s2, %s4590_s22  ;;  %p4594_p3 = scmp.lt.u32.totalorder %s4590_s22, %s5029_s2 }
  0x28   :  { %p4596_p4 = pnand %p4594_p3, %p4591_p2 }
  0x2a   :  { %4599 = shalt.err (!%p4596_p4)
}
  0x2b   :  { %s4600_s27 = scalar_lea.vmem %s43_s10, 128  ;;  %p4605_p6 = scmp.lt.s32.totalorder %s43_s10, %s43_s10 }
  0x2c   :  { %p4601_p5 = scmp.ne.s32.totalorder %s43_s10, %s4600_s27  ;;  %p4606_p7 = scmp.lt.s32.totalorder %s4600_s27, %s4600_s27 }
  0x2e   :  { %p4607_p8 = por %p4606_p7, %p4605_p6 }
  0x30   :  { %p4608_p9 = pnand %p4607_p8, %p4601_p5 }
  0x32   :  { %4611 = shalt.err (!%p4608_p9)
}
  0x33   :  { %45 = dma.hbm_to_vmem [thread:$0]  %s5029_s2, 128, %s43_s10, [#allocation6]  }
  0x34   :  { %s4669_s29 = smov [#allocation8]   ;;  %s4612_s8 = scalar_lea.hbm %s5031_s4, 16 }
  0x35   :  { %s54_s30 = sshll.u32 %s4669_s29, 4  ;;  %p4613_p10 = scmp.ne.s32.totalorder %s5031_s4, %s4612_s8  ;;  %s55_s30 = int_to_ptr.vmem [resolvable:$true] %s54_s30 }
  0x36   :  { %p4616_p11 = scmp.lt.u32.totalorder %s4612_s8, %s5031_s4 }
  0x38   :  { %p4618_p12 = pnand %p4616_p11, %p4613_p10 }
  0x3a   :  { %4621 = shalt.err (!%p4618_p12)
}
  0x3b   :  { %s4622_s14 = scalar_lea.vmem %s55_s30, 16  ;;  %s4626_s2 = scalar_lea.vmem %s55_s30, 32 }
  0x3c   :  { %p4623_p13 = scmp.ne.s32.totalorder %s55_s30, %s4622_s14  ;;  %p4627_p0 = scmp.lt.s32.totalorder %s55_s30, %s55_s30 }
  0x3d   :  { %p4628_p1 = scmp.lt.s32.totalorder %s4626_s2, %s4622_s14 }
  0x3f   :  { %p4629_p2 = por %p4628_p1, %p4627_p0 }
  0x41   :  { %p4630_p3 = pnand %p4629_p2, %p4623_p13 }
  0x43   :  { %4633 = shalt.err (!%p4630_p3)
}
  0x44   :  { %57 = dma.hbm_to_vmem [thread:$0]  %s5031_s4, 16, %s55_s30, [#allocation9]  }
  0x45   :  { %4656 = dma.done.wait [#allocation3], 896  }
  0x46   :  { %4657 = vsyncadd [#allocation3], 4294966400 }
  0x47   :  { %4658 = dma.done.wait [#allocation6], 50304  }
  0x48   :  { %4659 = vsyncadd [#allocation6], 4294916992 }
  0x49   :  { %4660 = dma.done.wait [#allocation9], 16  }
  0x4a   :  { %4661 = vsyncadd [#allocation9], 4294967280  ;;  %v85_v0 = vld [vmem:[#allocation5] sm:$0xff]  ;;  %v86_v2 = vld [vmem:[#allocation5 + $0x8] sm:$0xff]  ;;  %vm2479_vm0 = vcmask 130048   ;;  %vm3834_vm1 = vcmask 80896  }
  0x4b   :  { %v89_v1 = vld [vmem:[#allocation5 + $0x20] sm:$0xff]  ;;  %v90_v4 = vld [vmem:[#allocation5 + $0x28] sm:$0xff]  ;;  %v72_v53 = vld [vmem:[#allocation2 + $0x8] sm:$0xff] }
  0x4c   :  { %v3866_v3 = vcombine.high %v85_v0, %v89_v1  ;;  %v3865_v5 = vcombine.low %v85_v0, %v89_v1  ;;  %v93_v6 = vld [vmem:[#allocation5 + $0x40] sm:$0xff]  ;;  %v3868_v8 = vcombine.high %v86_v2, %v90_v4  ;;  %v3867_v9 = vcombine.low %v86_v2, %v90_v4  ;;  %v94_v11 = vld [vmem:[#allocation5 + $0x48] sm:$0xff] }
  0x4d   :  { %v97_v7 = vld [vmem:[#allocation5 + $0x60] sm:$0xff]  ;;  %v98_v12 = vld [vmem:[#allocation5 + $0x68] sm:$0xff]  ;;  %v4750_v57 = vpack.c.bf16 %v72_v53, %v72_v53 }
  0x4e   :  { %v3874_v10 = vcombine.high %v93_v6, %v97_v7  ;;  %v101_v13 = vld [vmem:[#allocation5 + $0x80] sm:$0xff]  ;;  %2483 = vmatprep.subr.bf16.mxu0 %v3866_v3  ;;  %v3876_v14 = vcombine.high %v94_v11, %v98_v12  ;;  %v102_v16 = vld [vmem:[#allocation5 + $0x88] sm:$0xff]  ;;  %2647 = vmatprep.subr.bf16.mxu1 %v3868_v8  ;;  %v3873_v18 = vcombine.low %v93_v6, %v97_v7 }
  0x4f   :  { %v105_v15 = vld [vmem:[#allocation5 + $0xa0] sm:$0xff]  ;;  %v106_v17 = vld [vmem:[#allocation5 + $0xa8] sm:$0xff]  ;;  %2484 = vmatpush1.bf16.msra.mxu0 %v3865_v5  ;;  %2648 = vmatpush1.bf16.msra.mxu1 %v3867_v9  ;;  %v3875_v19 = vcombine.low %v94_v11, %v98_v12 }
  0x50   :  { %2485 = vmatprep.subr.bf16.mxu0 %v3874_v10  ;;  %v3882_v20 = vcombine.high %v101_v13, %v105_v15  ;;  %2649 = vmatprep.subr.bf16.mxu1 %v3876_v14  ;;  %v3884_v21 = vcombine.high %v102_v16, %v106_v17  ;;  %v109_v22 = vld [vmem:[#allocation5 + $0xc0] sm:$0xff]  ;;  %v110_v24 = vld [vmem:[#allocation5 + $0xc8] sm:$0xff]  ;;  %v3881_v26 = vcombine.low %v101_v13, %v105_v15 }
  0x51   :  { %v113_v23 = vld [vmem:[#allocation5 + $0xe0] sm:$0xff]  ;;  %v114_v25 = vld [vmem:[#allocation5 + $0xe8] sm:$0xff]  ;;  %v3883_v27 = vcombine.low %v102_v16, %v106_v17  ;;  %2515 = vmatprep.mubr.bf16.mxu0 %v4750_v57  ;;  %2679 = vmatprep.mubr.bf16.mxu1 %v4750_v57 }
  0x52   :  { %v3890_v28 = vcombine.high %v109_v22, %v113_v23  ;;  %v3892_v29 = vcombine.high %v110_v24, %v114_v25  ;;  %v117_v30 = vld [vmem:[#allocation5 + $0x100] sm:$0xff]  ;;  %v118_v32 = vld [vmem:[#allocation5 + $0x108] sm:$0xff]  ;;  %v3889_v34 = vcombine.low %v109_v22, %v113_v23  ;;  %v3891_v35 = vcombine.low %v110_v24, %v114_v25 }
  0x53   :  { %2486 = vmatpush1.bf16.msra.mxu0 %v3873_v18  ;;  %2650 = vmatpush1.bf16.msra.mxu1 %v3875_v19  ;;  %v121_v31 = vld [vmem:[#allocation5 + $0x120] sm:$0xff]  ;;  %v122_v33 = vld [vmem:[#allocation5 + $0x128] sm:$0xff] }
  0x54   :  { %2487 = vmatprep.subr.bf16.mxu0 %v3882_v20  ;;  %2651 = vmatprep.subr.bf16.mxu1 %v3884_v21  ;;  %v3898_v36 = vcombine.high %v117_v30, %v121_v31  ;;  %v3900_v37 = vcombine.high %v118_v32, %v122_v33  ;;  %v125_v38 = vld [vmem:[#allocation5 + $0x140] sm:$0xff]  ;;  %v126_v40 = vld [vmem:[#allocation5 + $0x148] sm:$0xff]  ;;  %v3897_v42 = vcombine.low %v117_v30, %v121_v31 }
  0x55   :  { %v129_v39 = vld [vmem:[#allocation5 + $0x160] sm:$0xff]  ;;  %v130_v41 = vld [vmem:[#allocation5 + $0x168] sm:$0xff]  ;;  %v3899_v43 = vcombine.low %v118_v32, %v122_v33 }
  0x56   :  { %v3906_v44 = vcombine.high %v125_v38, %v129_v39  ;;  %v3908_v45 = vcombine.high %v126_v40, %v130_v41  ;;  %v133_v46 = vld [vmem:[#allocation5 + $0x180] sm:$0xff]  ;;  %v134_v48 = vld [vmem:[#allocation5 + $0x188] sm:$0xff]  ;;  %v3905_v50 = vcombine.low %v125_v38, %v129_v39  ;;  %v3907_v51 = vcombine.low %v126_v40, %v130_v41 }
  0x57   :  { %2488 = vmatpush1.bf16.msra.mxu0 %v3881_v26  ;;  %2652 = vmatpush1.bf16.msra.mxu1 %v3883_v27  ;;  %v137_v47 = vld [vmem:[#allocation5 + $0x1a0] sm:$0xff]  ;;  %v138_v49 = vld [vmem:[#allocation5 + $0x1a8] sm:$0xff] }
  0x58   :  { %2489 = vmatprep.subr.bf16.mxu0 %v3890_v28  ;;  %2653 = vmatprep.subr.bf16.mxu1 %v3892_v29  ;;  %v3914_v52 = vcombine.high %v133_v46, %v137_v47  ;;  %v3916_v54 = vcombine.high %v134_v48, %v138_v49  ;;  %v141_v55 = vld [vmem:[#allocation5 + $0x1c0] sm:$0xff]  ;;  %v142_v58 = vld [vmem:[#allocation5 + $0x1c8] sm:$0xff]  ;;  %v3913_v60 = vcombine.low %v133_v46, %v137_v47 }
  0x59   :  { %v145_v56 = vld [vmem:[#allocation5 + $0x1e0] sm:$0xff]  ;;  %v146_v59 = vld [vmem:[#allocation5 + $0x1e8] sm:$0xff]  ;;  %v3915_v61 = vcombine.low %v134_v48, %v138_v49 }
  0x5a   :  { %v3922_v62 = vcombine.high %v141_v55, %v145_v56  ;;  %v3924_v63 = vcombine.high %v142_v58, %v146_v59  ;;  %v149_v0 = vld [vmem:[#allocation5 + $0x200] sm:$0xff]  ;;  %v150_v2 = vld [vmem:[#allocation5 + $0x208] sm:$0xff]  ;;  %v3921_v4 = vcombine.low %v141_v55, %v145_v56  ;;  %v3923_v5 = vcombine.low %v142_v58, %v146_v59 }
  0x5b   :  { %2490 = vmatpush1.bf16.msra.mxu0 %v3889_v34  ;;  %2654 = vmatpush1.bf16.msra.mxu1 %v3891_v35  ;;  %v153_v1 = vld [vmem:[#allocation5 + $0x220] sm:$0xff]  ;;  %v154_v3 = vld [vmem:[#allocation5 + $0x228] sm:$0xff] }
  0x5c   :  { %2491 = vmatprep.subr.bf16.mxu0 %v3898_v36  ;;  %2655 = vmatprep.subr.bf16.mxu1 %v3900_v37  ;;  %v3930_v6 = vcombine.high %v149_v0, %v153_v1  ;;  %v3932_v7 = vcombine.high %v150_v2, %v154_v3  ;;  %v157_v8 = vld [vmem:[#allocation5 + $0x240] sm:$0xff]  ;;  %v158_v10 = vld [vmem:[#allocation5 + $0x248] sm:$0xff]  ;;  %v3929_v12 = vcombine.low %v149_v0, %v153_v1 }
  0x5d   :  { %v161_v9 = vld [vmem:[#allocation5 + $0x260] sm:$0xff]  ;;  %v162_v11 = vld [vmem:[#allocation5 + $0x268] sm:$0xff]  ;;  %v3931_v13 = vcombine.low %v150_v2, %v154_v3 }
  0x5e   :  { %v3938_v14 = vcombine.high %v157_v8, %v161_v9  ;;  %v3940_v15 = vcombine.high %v158_v10, %v162_v11  ;;  %v165_v16 = vld [vmem:[#allocation5 + $0x280] sm:$0xff]  ;;  %v166_v18 = vld [vmem:[#allocation5 + $0x288] sm:$0xff]  ;;  %v3937_v20 = vcombine.low %v157_v8, %v161_v9  ;;  %v3939_v21 = vcombine.low %v158_v10, %v162_v11 }
  0x5f   :  { %2492 = vmatpush1.bf16.msra.mxu0 %v3897_v42  ;;  %2656 = vmatpush1.bf16.msra.mxu1 %v3899_v43  ;;  %v169_v17 = vld [vmem:[#allocation5 + $0x2a0] sm:$0xff]  ;;  %v170_v19 = vld [vmem:[#allocation5 + $0x2a8] sm:$0xff] }
  0x60   :  { %2493 = vmatprep.subr.bf16.mxu0 %v3906_v44  ;;  %2657 = vmatprep.subr.bf16.mxu1 %v3908_v45  ;;  %v3946_v22 = vcombine.high %v165_v16, %v169_v17  ;;  %v3948_v23 = vcombine.high %v166_v18, %v170_v19  ;;  %v173_v24 = vld [vmem:[#allocation5 + $0x2c0] sm:$0xff]  ;;  %v174_v26 = vld [vmem:[#allocation5 + $0x2c8] sm:$0xff]  ;;  %v3945_v28 = vcombine.low %v165_v16, %v169_v17 }
  0x61   :  { %v177_v25 = vld [vmem:[#allocation5 + $0x2e0] sm:$0xff]  ;;  %v178_v27 = vld [vmem:[#allocation5 + $0x2e8] sm:$0xff]  ;;  %v3947_v29 = vcombine.low %v166_v18, %v170_v19 }
  0x62   :  { %v3954_v30 = vcombine.high %v173_v24, %v177_v25  ;;  %v3956_v31 = vcombine.high %v174_v26, %v178_v27  ;;  %v181_v32 = vld [vmem:[#allocation5 + $0x300] sm:$0xff]  ;;  %v182_v34 = vld [vmem:[#allocation5 + $0x308] sm:$0xff]  ;;  %v3953_v36 = vcombine.low %v173_v24, %v177_v25  ;;  %v3955_v37 = vcombine.low %v174_v26, %v178_v27 }
  0x63   :  { %2494 = vmatpush1.bf16.msra.mxu0 %v3905_v50  ;;  %2658 = vmatpush1.bf16.msra.mxu1 %v3907_v51  ;;  %v185_v33 = vld [vmem:[#allocation5 + $0x320] sm:$0xff]  ;;  %v186_v35 = vld [vmem:[#allocation5 + $0x328] sm:$0xff] }
  0x64   :  { %2495 = vmatprep.subr.bf16.mxu0 %v3914_v52  ;;  %2659 = vmatprep.subr.bf16.mxu1 %v3916_v54  ;;  %v3962_v38 = vcombine.high %v181_v32, %v185_v33  ;;  %v3964_v39 = vcombine.high %v182_v34, %v186_v35  ;;  %v189_v40 = vld [vmem:[#allocation5 + $0x340] sm:$0xff]  ;;  %v190_v42 = vld [vmem:[#allocation5 + $0x348] sm:$0xff]  ;;  %v3961_v44 = vcombine.low %v181_v32, %v185_v33 }
  0x65   :  { %v193_v41 = vld [vmem:[#allocation5 + $0x360] sm:$0xff]  ;;  %v194_v43 = vld [vmem:[#allocation5 + $0x368] sm:$0xff]  ;;  %v3963_v45 = vcombine.low %v182_v34, %v186_v35 }
  0x66   :  { %v3970_v46 = vcombine.high %v189_v40, %v193_v41  ;;  %v3972_v47 = vcombine.high %v190_v42, %v194_v43  ;;  %v197_v48 = vld [vmem:[#allocation5 + $0x380] sm:$0xff]  ;;  %v198_v50 = vld [vmem:[#allocation5 + $0x388] sm:$0xff]  ;;  %v3969_v52 = vcombine.low %v189_v40, %v193_v41  ;;  %v3971_v53 = vcombine.low %v190_v42, %v194_v43 }
  0x67   :  { %2496 = vmatpush1.bf16.msra.mxu0 %v3913_v60  ;;  %2660 = vmatpush1.bf16.msra.mxu1 %v3915_v61  ;;  %v201_v49 = vld [vmem:[#allocation5 + $0x3a0] sm:$0xff]  ;;  %v202_v51 = vld [vmem:[#allocation5 + $0x3a8] sm:$0xff] }
  0x68   :  { %2497 = vmatprep.subr.bf16.mxu0 %v3922_v62  ;;  %2661 = vmatprep.subr.bf16.mxu1 %v3924_v63  ;;  %v3978_v54 = vcombine.high %v197_v48, %v201_v49  ;;  %v3980_v55 = vcombine.high %v198_v50, %v202_v51  ;;  %v205_v56 = vld [vmem:[#allocation5 + $0x3c0] sm:$0xff]  ;;  %v206_v59 = vld [vmem:[#allocation5 + $0x3c8] sm:$0xff]  ;;  %v3977_v61 = vcombine.low %v197_v48, %v201_v49 }
  0x69   :  { %v209_v58 = vld [vmem:[#allocation5 + $0x3e0] sm:$0xff]  ;;  %v210_v60 = vld [vmem:[#allocation5 + $0x3e8] sm:$0xff]  ;;  %v3979_v62 = vcombine.low %v198_v50, %v202_v51 }
  0x6a   :  { %v3986_v63 = vcombine.high %v205_v56, %v209_v58  ;;  %v3988_v0 = vcombine.high %v206_v59, %v210_v60  ;;  %v213_v1 = vld [vmem:[#allocation5 + $0x400] sm:$0xff]  ;;  %v214_v3 = vld [vmem:[#allocation5 + $0x408] sm:$0xff] }
  0x6b   :  { %2498 = vmatpush1.bf16.msra.mxu0 %v3921_v4  ;;  %2662 = vmatpush1.bf16.msra.mxu1 %v3923_v5  ;;  %v217_v2 = vld [vmem:[#allocation5 + $0x420] sm:$0xff]  ;;  %v218_v4 = vld [vmem:[#allocation5 + $0x428] sm:$0xff]  ;;  %v3985_v5 = vcombine.low %v205_v56, %v209_v58 }
  0x6c   :  { %2499 = vmatprep.subr.bf16.mxu0 %v3930_v6  ;;  %2663 = vmatprep.subr.bf16.mxu1 %v3932_v7  ;;  %v71_v6 = vld [vmem:[#allocation2] sm:$0xff]  ;;  %v3987_v7 = vcombine.low %v206_v59, %v210_v60  ;;  %v3994_v8 = vcombine.high %v213_v1, %v217_v2  ;;  %v3996_v9 = vcombine.high %v214_v3, %v218_v4  ;;  %v221_v10 = vld [vmem:[#allocation5 + $0x440] sm:$0xff] }
  0x6d   :  { %v225_v11 = vld [vmem:[#allocation5 + $0x460] sm:$0xff]  ;;  %v3993_v16 = vcombine.low %v213_v1, %v217_v2  ;;  %v3995_v17 = vcombine.low %v214_v3, %v218_v4  ;;  %v234_v24 = vld [vmem:[#allocation5 + $0x4a8] sm:$0xff] }
  0x6e   :  { %v4002_v18 = vcombine.high %v221_v10, %v225_v11  ;;  %v229_v19 = vld [vmem:[#allocation5 + $0x480] sm:$0xff]  ;;  %v4001_v25 = vcombine.low %v221_v10, %v225_v11  ;;  %v242_v32 = vld [vmem:[#allocation5 + $0x4e8] sm:$0xff] }
  0x6f   :  { %2500 = vmatpush1.bf16.msra.mxu0 %v3929_v12  ;;  %2664 = vmatpush1.bf16.msra.mxu1 %v3931_v13  ;;  %v4754_v12 = vpack.c.bf16 %v71_v6, %v71_v6  ;;  %v222_v13 = vld [vmem:[#allocation5 + $0x448] sm:$0xff]  ;;  %v245_v34 = vld [vmem:[#allocation5 + $0x500] sm:$0xff] }
  0x70   :  { %2501 = vmatprep.subr.bf16.mxu0 %v3938_v14  ;;  %2665 = vmatprep.subr.bf16.mxu1 %v3940_v15  ;;  %v226_v14 = vld [vmem:[#allocation5 + $0x468] sm:$0xff]  ;;  %v74_v15 = vld [vmem:[#allocation2 + $0x18] sm:$0xff] }
  0x71   :  { %v4003_v26 = vcombine.low %v222_v13, %v226_v14  ;;  %v249_v35 = vld [vmem:[#allocation5 + $0x520] sm:$0xff]  ;;  %v266_v56 = vld [vmem:[#allocation5 + $0x5a8] sm:$0xff] }
  0x72   :  { %v253_v42 = vld [vmem:[#allocation5 + $0x540] sm:$0xff]  ;;  %v4025_v49 = vcombine.low %v245_v34, %v249_v35  ;;  %v274_v1 = vld [vmem:[#allocation5 + $0x5e8] sm:$0xff] }
  0x73   :  { %2502 = vmatpush1.bf16.msra.mxu0 %v3937_v20  ;;  %2666 = vmatpush1.bf16.msra.mxu1 %v3939_v21  ;;  %v233_v20 = vld [vmem:[#allocation5 + $0x4a0] sm:$0xff]  ;;  %v4004_v21 = vcombine.high %v222_v13, %v226_v14 }
  0x74   :  { %2503 = vmatprep.subr.bf16.mxu0 %v3946_v22  ;;  %2667 = vmatprep.subr.bf16.mxu1 %v3948_v23  ;;  %v4756_v22 = vpack.c.bf16 %v74_v15, %v74_v15  ;;  %v230_v23 = vld [vmem:[#allocation5 + $0x488] sm:$0xff]  ;;  %v4010_v27 = vcombine.high %v229_v19, %v233_v20  ;;  %v4009_v33 = vcombine.low %v229_v19, %v233_v20  ;;  %v257_v43 = vld [vmem:[#allocation5 + $0x560] sm:$0xff] }
  0x75   :  { %v4034_v51 = vcombine.high %v253_v42, %v257_v43  ;;  %v4033_v58 = vcombine.low %v253_v42, %v257_v43  ;;  %v281_v6 = vld [vmem:[#allocation5 + $0x620] sm:$0xff]  ;;  %v314_v43 = vld [vmem:[#allocation5 + $0x728] sm:$0xff] }
  0x76   :  { %v285_v14 = vld [vmem:[#allocation5 + $0x640] sm:$0xff] }
  0x77   :  { %2504 = vmatpush1.bf16.msra.mxu0 %v3945_v28  ;;  %2668 = vmatpush1.bf16.msra.mxu1 %v3947_v29  ;;  %v4012_v28 = vcombine.high %v230_v23, %v234_v24  ;;  %v237_v29 = vld [vmem:[#allocation5 + $0x4c0] sm:$0xff] }
  0x78   :  { %2505 = vmatprep.subr.bf16.mxu0 %v3954_v30  ;;  %2669 = vmatprep.subr.bf16.mxu1 %v3956_v31  ;;  %v241_v30 = vld [vmem:[#allocation5 + $0x4e0] sm:$0xff]  ;;  %v238_v31 = vld [vmem:[#allocation5 + $0x4c8] sm:$0xff] }
  0x79   :  { %v4020_v40 = vcombine.high %v238_v31, %v242_v32  ;;  %v4017_v41 = vcombine.low %v237_v29, %v241_v30  ;;  %v289_v15 = vld [vmem:[#allocation5 + $0x660] sm:$0xff] }
  0x7b   :  { %2506 = vmatpush1.bf16.msra.mxu0 %v3953_v36  ;;  %2670 = vmatpush1.bf16.msra.mxu1 %v3955_v37  ;;  %v4011_v36 = vcombine.low %v230_v23, %v234_v24  ;;  %v4018_v37 = vcombine.high %v237_v29, %v241_v30  ;;  %v293_v23 = vld [vmem:[#allocation5 + $0x680] sm:$0xff] }
  0x7c   :  { %2507 = vmatprep.subr.bf16.mxu0 %v3962_v38  ;;  %2671 = vmatprep.subr.bf16.mxu1 %v3964_v39  ;;  %v246_v38 = vld [vmem:[#allocation5 + $0x508] sm:$0xff]  ;;  %v297_v24 = vld [vmem:[#allocation5 + $0x6a0] sm:$0xff] }
  0x7d   :  { %v250_v39 = vld [vmem:[#allocation5 + $0x528] sm:$0xff]  ;;  %v4074_v30 = vcombine.high %v293_v23, %v297_v24 }
  0x7e   :  { %v4028_v48 = vcombine.high %v246_v38, %v250_v39  ;;  %v4027_v50 = vcombine.low %v246_v38, %v250_v39  ;;  %v309_v39 = vld [vmem:[#allocation5 + $0x700] sm:$0xff] }
  0x7f   :  { %2508 = vmatpush1.bf16.msra.mxu0 %v3961_v44  ;;  %2672 = vmatpush1.bf16.msra.mxu1 %v3963_v45  ;;  %v4019_v44 = vcombine.low %v238_v31, %v242_v32  ;;  %v4026_v45 = vcombine.high %v245_v34, %v249_v35  ;;  %v301_v31 = vld [vmem:[#allocation5 + $0x6c0] sm:$0xff]  ;;  %v306_v35 = vld [vmem:[#allocation5 + $0x6e8] sm:$0xff] }
  0x80   :  { %2509 = vmatprep.subr.bf16.mxu0 %v3970_v46  ;;  %2673 = vmatprep.subr.bf16.mxu1 %v3972_v47  ;;  %v254_v46 = vld [vmem:[#allocation5 + $0x548] sm:$0xff]  ;;  %v305_v32 = vld [vmem:[#allocation5 + $0x6e0] sm:$0xff] }
  0x81   :  { %v258_v47 = vld [vmem:[#allocation5 + $0x568] sm:$0xff]  ;;  %v4082_v38 = vcombine.high %v301_v31, %v305_v32 }
  0x82   :  { %v4035_v59 = vcombine.low %v254_v46, %v258_v47 }
  0x83   :  { %2510 = vmatpush1.bf16.msra.mxu0 %v3969_v52  ;;  %2674 = vmatpush1.bf16.msra.mxu1 %v3971_v53  ;;  %v261_v52 = vld [vmem:[#allocation5 + $0x580] sm:$0xff] }
  0x84   :  { %2511 = vmatprep.subr.bf16.mxu0 %v3978_v54  ;;  %2675 = vmatprep.subr.bf16.mxu1 %v3980_v55  ;;  %v265_v53 = vld [vmem:[#allocation5 + $0x5a0] sm:$0xff]  ;;  %v262_v54 = vld [vmem:[#allocation5 + $0x588] sm:$0xff]  ;;  %v4036_v55 = vcombine.high %v254_v46, %v258_v47 }
  0x85   :  { %v4042_v60 = vcombine.high %v261_v52, %v265_v53  ;;  %v4041_v2 = vcombine.low %v261_v52, %v265_v53  ;;  %v4043_v3 = vcombine.low %v262_v54, %v266_v56  ;;  %v317_v47 = vld [vmem:[#allocation5 + $0x740] sm:$0xff] }
  0x87   :  { %2512 = vmatpush1.bf16.msra.mxu0 %v3977_v61  ;;  %2676 = vmatpush1.bf16.msra.mxu1 %v3979_v62  ;;  %v269_v61 = vld [vmem:[#allocation5 + $0x5c0] sm:$0xff] }
  0x88   :  { %2513 = vmatprep.subr.bf16.mxu0 %v3986_v63  ;;  %2677 = vmatprep.subr.bf16.mxu1 %v3988_v0  ;;  %v273_v62 = vld [vmem:[#allocation5 + $0x5e0] sm:$0xff]  ;;  %v270_v63 = vld [vmem:[#allocation5 + $0x5c8] sm:$0xff]  ;;  %v4044_v0 = vcombine.high %v262_v54, %v266_v56 }
  0x89   :  { %v4050_v4 = vcombine.high %v269_v61, %v273_v62  ;;  %v4049_v10 = vcombine.low %v269_v61, %v273_v62  ;;  %v4051_v11 = vcombine.low %v270_v63, %v274_v1  ;;  %v329_v56 = vld [vmem:[#allocation5 + $0x7a0] sm:$0xff] }
  0x8b   :  { %2514 = vmatpush1.bf16.msra.mxu0 %v3985_v5  ;;  %2678 = vmatpush1.bf16.msra.mxu1 %v3987_v7  ;;  %v277_v5 = vld [vmem:[#allocation5 + $0x600] sm:$0xff]  ;;  %v278_v7 = vld [vmem:[#allocation5 + $0x608] sm:$0xff] }
  0x8c   :  { %2524 = vmatprep.subr.bf16.mxu0 %v3994_v8  ;;  %2688 = vmatprep.subr.bf16.mxu1 %v3996_v9  ;;  %v4052_v8 = vcombine.high %v270_v63, %v274_v1  ;;  %v282_v9 = vld [vmem:[#allocation5 + $0x628] sm:$0xff]  ;;  %v4058_v13 = vcombine.high %v277_v5, %v281_v6  ;;  %v4057_v19 = vcombine.low %v277_v5, %v281_v6  ;;  %v337_v1 = vld [vmem:[#allocation5 + $0x7e0] sm:$0xff] }
  0x8d   :  { %v4059_v20 = vcombine.low %v278_v7, %v282_v9  ;;  %v341_v6 = vld [vmem:[#allocation5 + $0x800] sm:$0xff] }
  0x8e   :  { %2516 = vmatmul.mubr.bf16.vlgmr.msra.gmra.mrb[0].mxu0 %v4754_v12  ;;  %2680 = vmatmul.mubr.bf16.vlgmr.msra.gmra.mrb[0].mxu1 %v4754_v12 }
  0x8f   :  { %2525 = vmatpush1.bf16.msra.mxu0 %v3993_v16  ;;  %2689 = vmatpush1.bf16.msra.mxu1 %v3995_v17  ;;  %v286_v16 = vld [vmem:[#allocation5 + $0x648] sm:$0xff]  ;;  %v4060_v17 = vcombine.high %v278_v7, %v282_v9  ;;  %v345_v9 = vld [vmem:[#allocation5 + $0x820] sm:$0xff] }
  0x90   :  { %2526 = vmatprep.subr.bf16.mxu0 %v4002_v18  ;;  %2690 = vmatprep.subr.bf16.mxu1 %v4004_v21  ;;  %v290_v18 = vld [vmem:[#allocation5 + $0x668] sm:$0xff]  ;;  %v4066_v21 = vcombine.high %v285_v14, %v289_v15 }
  0x91   :  { %2556 = vmatprep.mubr.bf16.mxu0 %v4756_v22  ;;  %2720 = vmatprep.mubr.bf16.mxu1 %v4756_v22  ;;  %v4067_v29 = vcombine.low %v286_v16, %v290_v18 }
  0x93   :  { %2527 = vmatpush1.bf16.msra.mxu0 %v4001_v25  ;;  %2691 = vmatpush1.bf16.msra.mxu1 %v4003_v26  ;;  %v294_v25 = vld [vmem:[#allocation5 + $0x688] sm:$0xff]  ;;  %v4068_v26 = vcombine.high %v286_v16, %v290_v18  ;;  %v349_v16 = vld [vmem:[#allocation5 + $0x840] sm:$0xff]  ;;  %v4122_v18 = vcombine.high %v341_v6, %v345_v9 }
  0x94   :  { %2528 = vmatprep.subr.bf16.mxu0 %v4010_v27  ;;  %2692 = vmatprep.subr.bf16.mxu1 %v4012_v28  ;;  %v298_v27 = vld [vmem:[#allocation5 + $0x6a8] sm:$0xff]  ;;  %v4065_v28 = vcombine.low %v285_v14, %v289_v15  ;;  %v73_v14 = vld [vmem:[#allocation2 + $0x10] sm:$0xff] }
  0x95   :  { %v4076_v34 = vcombine.high %v294_v25, %v298_v27 }
  0x97   :  { %2529 = vmatpush1.bf16.msra.mxu0 %v4009_v33  ;;  %2693 = vmatpush1.bf16.msra.mxu1 %v4011_v36  ;;  %v302_v33 = vld [vmem:[#allocation5 + $0x6c8] sm:$0xff]  ;;  %v4073_v36 = vcombine.low %v293_v23, %v297_v24  ;;  %v76_v24 = vld [vmem:[#allocation2 + $0x28] sm:$0xff] }
  0x98   :  { %2530 = vmatprep.subr.bf16.mxu0 %v4018_v37  ;;  %2694 = vmatprep.subr.bf16.mxu1 %v4020_v40  ;;  %v4075_v37 = vcombine.low %v294_v25, %v298_v27  ;;  %v313_v40 = vld [vmem:[#allocation5 + $0x720] sm:$0xff]  ;;  %v4084_v42 = vcombine.high %v302_v33, %v306_v35  ;;  %v4762_v25 = vpack.c.bf16 %v73_v14, %v73_v14 }
  0x99   :  { %v4090_v46 = vcombine.high %v309_v39, %v313_v40  ;;  %v4089_v52 = vcombine.low %v309_v39, %v313_v40  ;;  %v365_v39 = vld [vmem:[#allocation5 + $0x8c0] sm:$0xff] }
  0x9a   :  { %v369_v40 = vld [vmem:[#allocation5 + $0x8e0] sm:$0xff] }
  0x9b   :  { %2531 = vmatpush1.bf16.msra.mxu0 %v4017_v41  ;;  %2695 = vmatpush1.bf16.msra.mxu1 %v4019_v44  ;;  %v310_v41 = vld [vmem:[#allocation5 + $0x708] sm:$0xff]  ;;  %v4081_v44 = vcombine.low %v301_v31, %v305_v32  ;;  %v361_v31 = vld [vmem:[#allocation5 + $0x8a0] sm:$0xff]  ;;  %v4764_v32 = vpack.c.bf16 %v76_v24, %v76_v24 }
  0x9c   :  { %2532 = vmatprep.subr.bf16.mxu0 %v4026_v45  ;;  %2696 = vmatprep.subr.bf16.mxu1 %v4028_v48  ;;  %v4083_v45 = vcombine.low %v302_v33, %v306_v35  ;;  %v321_v48 = vld [vmem:[#allocation5 + $0x760] sm:$0xff]  ;;  %v4091_v53 = vcombine.low %v310_v41, %v314_v43  ;;  %v358_v33 = vld [vmem:[#allocation5 + $0x888] sm:$0xff] }
  0x9d   :  { %v4098_v54 = vcombine.high %v317_v47, %v321_v48  ;;  %v4097_v61 = vcombine.low %v317_v47, %v321_v48  ;;  %v373_v47 = vld [vmem:[#allocation5 + $0x900] sm:$0xff] }
  0x9e   :  { %v377_v48 = vld [vmem:[#allocation5 + $0x920] sm:$0xff] }
  0x9f   :  { %2533 = vmatpush1.bf16.msra.mxu0 %v4025_v49  ;;  %2697 = vmatpush1.bf16.msra.mxu1 %v4027_v50  ;;  %v318_v49 = vld [vmem:[#allocation5 + $0x748] sm:$0xff]  ;;  %v4092_v50 = vcombine.high %v310_v41, %v314_v43 }
  0xa0   :  { %2534 = vmatprep.subr.bf16.mxu0 %v4034_v51  ;;  %2698 = vmatprep.subr.bf16.mxu1 %v4036_v55  ;;  %v322_v51 = vld [vmem:[#allocation5 + $0x768] sm:$0xff]  ;;  %v325_v55 = vld [vmem:[#allocation5 + $0x780] sm:$0xff] }
  0xa1   :  { %v4099_v62 = vcombine.low %v318_v49, %v322_v51  ;;  %v4106_v63 = vcombine.high %v325_v55, %v329_v56  ;;  %v4105_v5 = vcombine.low %v325_v55, %v329_v56  ;;  %v366_v41 = vld [vmem:[#allocation5 + $0x8c8] sm:$0xff]  ;;  %v381_v55 = vld [vmem:[#allocation5 + $0x940] sm:$0xff] }
  0xa2   :  { %v385_v56 = vld [vmem:[#allocation5 + $0x960] sm:$0xff] }
  0xa3   :  { %2535 = vmatpush1.bf16.msra.mxu0 %v4033_v58  ;;  %2699 = vmatpush1.bf16.msra.mxu1 %v4035_v59  ;;  %v326_v58 = vld [vmem:[#allocation5 + $0x788] sm:$0xff]  ;;  %v4100_v59 = vcombine.high %v318_v49, %v322_v51  ;;  %v4145_v51 = vcombine.low %v365_v39, %v369_v40 }
  0xa4   :  { %2536 = vmatprep.subr.bf16.mxu0 %v4042_v60  ;;  %2700 = vmatprep.subr.bf16.mxu1 %v4044_v0  ;;  %v330_v60 = vld [vmem:[#allocation5 + $0x7a8] sm:$0xff]  ;;  %v333_v0 = vld [vmem:[#allocation5 + $0x7c0] sm:$0xff] }
  0xa5   :  { %v4107_v7 = vcombine.low %v326_v58, %v330_v60  ;;  %v4113_v15 = vcombine.low %v333_v0, %v337_v1  ;;  %v374_v49 = vld [vmem:[#allocation5 + $0x908] sm:$0xff] }
  0xa7   :  { %2537 = vmatpush1.bf16.msra.mxu0 %v4041_v2  ;;  %2701 = vmatpush1.bf16.msra.mxu1 %v4043_v3  ;;  %v334_v2 = vld [vmem:[#allocation5 + $0x7c8] sm:$0xff]  ;;  %v4108_v3 = vcombine.high %v326_v58, %v330_v60  ;;  %v4153_v60 = vcombine.low %v373_v47, %v377_v48 }
  0xa8   :  { %2538 = vmatprep.subr.bf16.mxu0 %v4050_v4  ;;  %2702 = vmatprep.subr.bf16.mxu1 %v4052_v8  ;;  %v338_v4 = vld [vmem:[#allocation5 + $0x7e8] sm:$0xff]  ;;  %v4114_v8 = vcombine.high %v333_v0, %v337_v1  ;;  %v389_v0 = vld [vmem:[#allocation5 + $0x980] sm:$0xff] }
  0xa9   :  { %v382_v58 = vld [vmem:[#allocation5 + $0x948] sm:$0xff]  ;;  %v393_v1 = vld [vmem:[#allocation5 + $0x9a0] sm:$0xff] }
  0xab   :  { %2539 = vmatpush1.bf16.msra.mxu0 %v4049_v10  ;;  %2703 = vmatpush1.bf16.msra.mxu1 %v4051_v11  ;;  %v342_v10 = vld [vmem:[#allocation5 + $0x808] sm:$0xff] }
  0xac   :  { %2540 = vmatprep.subr.bf16.mxu0 %v4058_v13  ;;  %2704 = vmatprep.subr.bf16.mxu1 %v4060_v17  ;;  %v346_v11 = vld [vmem:[#allocation5 + $0x828] sm:$0xff]  ;;  %v4116_v13 = vcombine.high %v334_v2, %v338_v4  ;;  %v4115_v17 = vcombine.low %v334_v2, %v338_v4  ;;  %v4161_v4 = vcombine.low %v381_v55, %v385_v56 }
  0xad   :  { %v4124_v23 = vcombine.high %v342_v10, %v346_v11  ;;  %v4123_v27 = vcombine.low %v342_v10, %v346_v11  ;;  %v390_v2 = vld [vmem:[#allocation5 + $0x988] sm:$0xff] }
  0xae   :  { %v398_v10 = vld [vmem:[#allocation5 + $0x9c8] sm:$0xff] }
  0xaf   :  { %2541 = vmatpush1.bf16.msra.mxu0 %v4057_v19  ;;  %2705 = vmatpush1.bf16.msra.mxu1 %v4059_v20  ;;  %v353_v19 = vld [vmem:[#allocation5 + $0x860] sm:$0xff]  ;;  %v350_v20 = vld [vmem:[#allocation5 + $0x848] sm:$0xff] }
  0xb0   :  { %2542 = vmatprep.subr.bf16.mxu0 %v4066_v21  ;;  %2706 = vmatprep.subr.bf16.mxu1 %v4068_v26  ;;  %v354_v21 = vld [vmem:[#allocation5 + $0x868] sm:$0xff]  ;;  %v4121_v26 = vcombine.low %v341_v6, %v345_v9  ;;  %v4129_v35 = vcombine.low %v349_v16, %v353_v19  ;;  %v4170_v6 = vcombine.high %v389_v0, %v393_v1  ;;  %v401_v9 = vld [vmem:[#allocation5 + $0x9e0] sm:$0xff] }
  0xb1   :  { %v402_v11 = vld [vmem:[#allocation5 + $0x9e8] sm:$0xff] }
  0xb3   :  { %2543 = vmatpush1.bf16.msra.mxu0 %v4065_v28  ;;  %2707 = vmatpush1.bf16.msra.mxu1 %v4067_v29  ;;  %v4130_v28 = vcombine.high %v349_v16, %v353_v19  ;;  %v4132_v29 = vcombine.high %v350_v20, %v354_v21  ;;  %v4180_v16 = vcombine.high %v398_v10, %v402_v11  ;;  %v406_v19 = vld [vmem:[#allocation5 + $0xa08] sm:$0xff] }
  0xb4   :  { %2544 = vmatprep.subr.bf16.mxu0 %v4074_v30  ;;  %2708 = vmatprep.subr.bf16.mxu1 %v4076_v34  ;;  %v357_v30 = vld [vmem:[#allocation5 + $0x880] sm:$0xff]  ;;  %v362_v34 = vld [vmem:[#allocation5 + $0x8a8] sm:$0xff] }
  0xb5   :  { %v4137_v43 = vcombine.low %v357_v30, %v361_v31 }
  0xb7   :  { %2545 = vmatpush1.bf16.msra.mxu0 %v4073_v36  ;;  %2709 = vmatpush1.bf16.msra.mxu1 %v4075_v37  ;;  %v4131_v36 = vcombine.low %v350_v20, %v354_v21  ;;  %v4138_v37 = vcombine.high %v357_v30, %v361_v31  ;;  %v410_v20 = vld [vmem:[#allocation5 + $0xa28] sm:$0xff] }
  0xb8   :  { %2546 = vmatprep.subr.bf16.mxu0 %v4082_v38  ;;  %2710 = vmatprep.subr.bf16.mxu1 %v4084_v42  ;;  %v4140_v38 = vcombine.high %v358_v33, %v362_v34  ;;  %v370_v42 = vld [vmem:[#allocation5 + $0x8e8] sm:$0xff] }
  0xb9   :  { %v418_v30 = vld [vmem:[#allocation5 + $0xa68] sm:$0xff] }
  0xbb   :  { %2547 = vmatpush1.bf16.msra.mxu0 %v4081_v44  ;;  %2711 = vmatpush1.bf16.msra.mxu1 %v4083_v45  ;;  %v4139_v44 = vcombine.low %v358_v33, %v362_v34  ;;  %v4146_v45 = vcombine.high %v365_v39, %v369_v40  ;;  %v4187_v33 = vcombine.low %v406_v19, %v410_v20  ;;  %v426_v39 = vld [vmem:[#allocation5 + $0xaa8] sm:$0xff] }
  0xbc   :  { %2548 = vmatprep.subr.bf16.mxu0 %v4090_v46  ;;  %2712 = vmatprep.subr.bf16.mxu1 %v4092_v50  ;;  %v4148_v46 = vcombine.high %v366_v41, %v370_v42  ;;  %v378_v50 = vld [vmem:[#allocation5 + $0x928] sm:$0xff] }
  0xbf   :  { %2549 = vmatpush1.bf16.msra.mxu0 %v4089_v52  ;;  %2713 = vmatpush1.bf16.msra.mxu1 %v4091_v53  ;;  %v4147_v52 = vcombine.low %v366_v41, %v370_v42  ;;  %v4154_v53 = vcombine.high %v373_v47, %v377_v48  ;;  %v434_v47 = vld [vmem:[#allocation5 + $0xae8] sm:$0xff] }
  0xc0   :  { %2550 = vmatprep.subr.bf16.mxu0 %v4098_v54  ;;  %2714 = vmatprep.subr.bf16.mxu1 %v4100_v59  ;;  %v4156_v54 = vcombine.high %v374_v49, %v378_v50  ;;  %v386_v59 = vld [vmem:[#allocation5 + $0x968] sm:$0xff] }
  0xc3   :  { %2551 = vmatpush1.bf16.msra.mxu0 %v4097_v61  ;;  %2715 = vmatpush1.bf16.msra.mxu1 %v4099_v62  ;;  %v4155_v61 = vcombine.low %v374_v49, %v378_v50  ;;  %v4162_v62 = vcombine.high %v381_v55, %v385_v56  ;;  %v442_v55 = vld [vmem:[#allocation5 + $0xb28] sm:$0xff] }
  0xc4   :  { %2552 = vmatprep.subr.bf16.mxu0 %v4106_v63  ;;  %2716 = vmatprep.subr.bf16.mxu1 %v4108_v3  ;;  %v4164_v63 = vcombine.high %v382_v58, %v386_v59  ;;  %v394_v3 = vld [vmem:[#allocation5 + $0x9a8] sm:$0xff] }
  0xc5   :  { %v4171_v14 = vcombine.low %v390_v2, %v394_v3 }
  0xc7   :  { %2553 = vmatpush1.bf16.msra.mxu0 %v4105_v5  ;;  %2717 = vmatpush1.bf16.msra.mxu1 %v4107_v7  ;;  %v4163_v5 = vcombine.low %v382_v58, %v386_v59  ;;  %v4172_v7 = vcombine.high %v390_v2, %v394_v3 }
  0xc8   :  { %2554 = vmatprep.subr.bf16.mxu0 %v4114_v8  ;;  %2718 = vmatprep.subr.bf16.mxu1 %v4116_v13  ;;  %v397_v8 = vld [vmem:[#allocation5 + $0x9c0] sm:$0xff]  ;;  %v4169_v13 = vcombine.low %v389_v0, %v393_v1  ;;  %v450_v0 = vld [vmem:[#allocation5 + $0xb68] sm:$0xff] }
  0xc9   :  { %v4177_v21 = vcombine.low %v397_v8, %v401_v9 }
  0xcb   :  { %2555 = vmatpush1.bf16.msra.mxu0 %v4113_v15  ;;  %2719 = vmatpush1.bf16.msra.mxu1 %v4115_v17  ;;  %v4178_v15 = vcombine.high %v397_v8, %v401_v9  ;;  %v405_v17 = vld [vmem:[#allocation5 + $0xa00] sm:$0xff]  ;;  %v458_v8 = vld [vmem:[#allocation5 + $0xba8] sm:$0xff] }
  0xcc   :  { %2565 = vmatprep.subr.bf16.mxu0 %v4122_v18  ;;  %2729 = vmatprep.subr.bf16.mxu1 %v4124_v23  ;;  %v409_v18 = vld [vmem:[#allocation5 + $0xa20] sm:$0xff]  ;;  %v4179_v23 = vcombine.low %v398_v10, %v402_v11 }
  0xcd   :  { %v4186_v24 = vcombine.high %v405_v17, %v409_v18  ;;  %v4185_v31 = vcombine.low %v405_v17, %v409_v18  ;;  %v466_v17 = vld [vmem:[#allocation5 + $0xbe8] sm:$0xff] }
  0xce   :  { %2557 = vmatmul.mubr.bf16.vlgmr.msra.gmra.mrb[0].mxu0 %v4762_v25  ;;  %2721 = vmatmul.mubr.bf16.vlgmr.msra.gmra.mrb[0].mxu1 %v4762_v25 }
  0xcf   :  { %2566 = vmatpush1.bf16.msra.mxu0 %v4121_v26  ;;  %2730 = vmatpush1.bf16.msra.mxu1 %v4123_v27  ;;  %v4188_v26 = vcombine.high %v406_v19, %v410_v20  ;;  %v413_v27 = vld [vmem:[#allocation5 + $0xa40] sm:$0xff] }
  0xd0   :  { %2567 = vmatprep.subr.bf16.mxu0 %v4130_v28  ;;  %2731 = vmatprep.subr.bf16.mxu1 %v4132_v29  ;;  %v417_v28 = vld [vmem:[#allocation5 + $0xa60] sm:$0xff]  ;;  %v414_v29 = vld [vmem:[#allocation5 + $0xa48] sm:$0xff] }
  0xd1   :  { %2597 = vmatprep.mubr.bf16.mxu0 %v4764_v32  ;;  %2761 = vmatprep.mubr.bf16.mxu1 %v4764_v32  ;;  %v4194_v34 = vcombine.high %v413_v27, %v417_v28  ;;  %v4193_v40 = vcombine.low %v413_v27, %v417_v28  ;;  %v4195_v41 = vcombine.low %v414_v29, %v418_v30  ;;  %v474_v27 = vld [vmem:[#allocation5 + $0xc28] sm:$0xff] }
  0xd3   :  { %2568 = vmatpush1.bf16.msra.mxu0 %v4129_v35  ;;  %2732 = vmatpush1.bf16.msra.mxu1 %v4131_v36  ;;  %v4196_v35 = vcombine.high %v414_v29, %v418_v30  ;;  %v421_v36 = vld [vmem:[#allocation5 + $0xa80] sm:$0xff]  ;;  %v75_v29 = vld [vmem:[#allocation2 + $0x20] sm:$0xff] }
  0xd4   :  { %2569 = vmatprep.subr.bf16.mxu0 %v4138_v37  ;;  %2733 = vmatprep.subr.bf16.mxu1 %v4140_v38  ;;  %v425_v37 = vld [vmem:[#allocation5 + $0xaa0] sm:$0xff]  ;;  %v422_v38 = vld [vmem:[#allocation5 + $0xa88] sm:$0xff] }
  0xd5   :  { %v4202_v42 = vcombine.high %v421_v36, %v425_v37  ;;  %v4201_v48 = vcombine.low %v421_v36, %v425_v37  ;;  %v4203_v49 = vcombine.low %v422_v38, %v426_v39  ;;  %v91_v36 = vld [vmem:[#allocation5 + $0x30] sm:$0xff] }
  0xd7   :  { %2570 = vmatpush1.bf16.msra.mxu0 %v4137_v43  ;;  %2734 = vmatpush1.bf16.msra.mxu1 %v4139_v44  ;;  %v4204_v43 = vcombine.high %v422_v38, %v426_v39  ;;  %v429_v44 = vld [vmem:[#allocation5 + $0xac0] sm:$0xff]  ;;  %v88_v38 = vld [vmem:[#allocation5 + $0x18] sm:$0xff] }
  0xd8   :  { %2571 = vmatprep.subr.bf16.mxu0 %v4146_v45  ;;  %2735 = vmatprep.subr.bf16.mxu1 %v4148_v46  ;;  %v433_v45 = vld [vmem:[#allocation5 + $0xae0] sm:$0xff]  ;;  %v430_v46 = vld [vmem:[#allocation5 + $0xac8] sm:$0xff]  ;;  %v92_v39 = vld [vmem:[#allocation5 + $0x38] sm:$0xff] }
  0xd9   :  { %v4210_v50 = vcombine.high %v429_v44, %v433_v45  ;;  %v4209_v56 = vcombine.low %v429_v44, %v433_v45  ;;  %v4211_v58 = vcombine.low %v430_v46, %v434_v47  ;;  %v77_v44 = vld [vmem:[#allocation2 + $0x30] sm:$0xff]  ;;  %v95_v45 = vld [vmem:[#allocation5 + $0x50] sm:$0xff] }
  0xdb   :  { %2572 = vmatpush1.bf16.msra.mxu0 %v4145_v51  ;;  %2736 = vmatpush1.bf16.msra.mxu1 %v4147_v52  ;;  %v4212_v51 = vcombine.high %v430_v46, %v434_v47  ;;  %v437_v52 = vld [vmem:[#allocation5 + $0xb00] sm:$0xff]  ;;  %v99_v46 = vld [vmem:[#allocation5 + $0x70] sm:$0xff]  ;;  %v4776_v47 = vpack.c.bf16 %v77_v44, %v77_v44 }
  0xdc   :  { %2573 = vmatprep.subr.bf16.mxu0 %v4154_v53  ;;  %2737 = vmatprep.subr.bf16.mxu1 %v4156_v54  ;;  %v441_v53 = vld [vmem:[#allocation5 + $0xb20] sm:$0xff]  ;;  %v438_v54 = vld [vmem:[#allocation5 + $0xb08] sm:$0xff]  ;;  %v151_v44 = vld [vmem:[#allocation5 + $0x210] sm:$0xff] }
  0xdd   :  { %v4218_v59 = vcombine.high %v437_v52, %v441_v53  ;;  %v4217_v1 = vcombine.low %v437_v52, %v441_v53  ;;  %v4219_v2 = vcombine.low %v438_v54, %v442_v55  ;;  %v3878_v52 = vcombine.high %v95_v45, %v99_v46 }
  0xdf   :  { %2574 = vmatpush1.bf16.msra.mxu0 %v4153_v60  ;;  %2738 = vmatpush1.bf16.msra.mxu1 %v4155_v61  ;;  %v4220_v60 = vcombine.high %v438_v54, %v442_v55  ;;  %v445_v61 = vld [vmem:[#allocation5 + $0xb40] sm:$0xff]  ;;  %v103_v54 = vld [vmem:[#allocation5 + $0x90] sm:$0xff] }
  0xe0   :  { %2575 = vmatprep.subr.bf16.mxu0 %v4162_v62  ;;  %2739 = vmatprep.subr.bf16.mxu1 %v4164_v63  ;;  %v449_v62 = vld [vmem:[#allocation5 + $0xb60] sm:$0xff]  ;;  %v446_v63 = vld [vmem:[#allocation5 + $0xb48] sm:$0xff]  ;;  %v107_v55 = vld [vmem:[#allocation5 + $0xb0] sm:$0xff] }
  0xe1   :  { %v4226_v3 = vcombine.high %v445_v61, %v449_v62  ;;  %v4225_v9 = vcombine.low %v445_v61, %v449_v62  ;;  %v4227_v10 = vcombine.low %v446_v63, %v450_v0  ;;  %v3886_v61 = vcombine.high %v103_v54, %v107_v55 }
  0xe3   :  { %2576 = vmatpush1.bf16.msra.mxu0 %v4161_v4  ;;  %2740 = vmatpush1.bf16.msra.mxu1 %v4163_v5  ;;  %v4228_v4 = vcombine.high %v446_v63, %v450_v0  ;;  %v453_v5 = vld [vmem:[#allocation5 + $0xb80] sm:$0xff]  ;;  %v111_v63 = vld [vmem:[#allocation5 + $0xd0] sm:$0xff] }
  0xe4   :  { %2577 = vmatprep.subr.bf16.mxu0 %v4170_v6  ;;  %2741 = vmatprep.subr.bf16.mxu1 %v4172_v7  ;;  %v457_v6 = vld [vmem:[#allocation5 + $0xba0] sm:$0xff]  ;;  %v454_v7 = vld [vmem:[#allocation5 + $0xb88] sm:$0xff]  ;;  %v115_v0 = vld [vmem:[#allocation5 + $0xf0] sm:$0xff] }
  0xe5   :  { %v4234_v11 = vcombine.high %v453_v5, %v457_v6  ;;  %v4233_v18 = vcombine.low %v453_v5, %v457_v6  ;;  %v4235_v19 = vcombine.low %v454_v7, %v458_v8  ;;  %v3894_v5 = vcombine.high %v111_v63, %v115_v0 }
  0xe7   :  { %2578 = vmatpush1.bf16.msra.mxu0 %v4169_v13  ;;  %2742 = vmatpush1.bf16.msra.mxu1 %v4171_v14  ;;  %v4236_v13 = vcombine.high %v454_v7, %v458_v8  ;;  %v461_v14 = vld [vmem:[#allocation5 + $0xbc0] sm:$0xff]  ;;  %v119_v7 = vld [vmem:[#allocation5 + $0x110] sm:$0xff] }
  0xe8   :  { %2579 = vmatprep.subr.bf16.mxu0 %v4178_v15  ;;  %2743 = vmatprep.subr.bf16.mxu1 %v4180_v16  ;;  %v465_v15 = vld [vmem:[#allocation5 + $0xbe0] sm:$0xff]  ;;  %v462_v16 = vld [vmem:[#allocation5 + $0xbc8] sm:$0xff]  ;;  %v123_v8 = vld [vmem:[#allocation5 + $0x130] sm:$0xff] }
  0xe9   :  { %v4242_v20 = vcombine.high %v461_v14, %v465_v15  ;;  %v4241_v28 = vcombine.low %v461_v14, %v465_v15  ;;  %v4243_v30 = vcombine.low %v462_v16, %v466_v17  ;;  %v3902_v14 = vcombine.high %v119_v7, %v123_v8  ;;  %v127_v15 = vld [vmem:[#allocation5 + $0x150] sm:$0xff] }
  0xeb   :  { %2580 = vmatpush1.bf16.msra.mxu0 %v4177_v21  ;;  %2744 = vmatpush1.bf16.msra.mxu1 %v4179_v23  ;;  %v4244_v21 = vcombine.high %v462_v16, %v466_v17  ;;  %v469_v23 = vld [vmem:[#allocation5 + $0xc00] sm:$0xff]  ;;  %v131_v16 = vld [vmem:[#allocation5 + $0x170] sm:$0xff]  ;;  %v128_v17 = vld [vmem:[#allocation5 + $0x158] sm:$0xff] }
  0xec   :  { %2581 = vmatprep.subr.bf16.mxu0 %v4186_v24  ;;  %2745 = vmatprep.subr.bf16.mxu1 %v4188_v26  ;;  %v473_v24 = vld [vmem:[#allocation5 + $0xc20] sm:$0xff]  ;;  %v470_v26 = vld [vmem:[#allocation5 + $0xc08] sm:$0xff] }
  0xed   :  { %v4249_v37 = vcombine.low %v469_v23, %v473_v24 }
  0xef   :  { %2582 = vmatpush1.bf16.msra.mxu0 %v4185_v31  ;;  %2746 = vmatpush1.bf16.msra.mxu1 %v4187_v33  ;;  %v4250_v31 = vcombine.high %v469_v23, %v473_v24  ;;  %v4252_v33 = vcombine.high %v470_v26, %v474_v27  ;;  %v135_v24 = vld [vmem:[#allocation5 + $0x190] sm:$0xff] }
  0xf0   :  { %2583 = vmatprep.subr.bf16.mxu0 %v4194_v34  ;;  %2747 = vmatprep.subr.bf16.mxu1 %v4196_v35  ;;  %v4770_v34 = vpack.c.bf16 %v75_v29, %v75_v29  ;;  %v87_v35 = vld [vmem:[#allocation5 + $0x10] sm:$0xff]  ;;  %v3909_v29 = vcombine.low %v127_v15, %v131_v16 }
  0xf3   :  { %2584 = vmatpush1.bf16.msra.mxu0 %v4193_v40  ;;  %2748 = vmatpush1.bf16.msra.mxu1 %v4195_v41  ;;  %v4251_v40 = vcombine.low %v470_v26, %v474_v27  ;;  %v3870_v41 = vcombine.high %v87_v35, %v91_v36  ;;  %v139_v26 = vld [vmem:[#allocation5 + $0x1b0] sm:$0xff]  ;;  %v136_v27 = vld [vmem:[#allocation5 + $0x198] sm:$0xff] }
  0xf4   :  { %2585 = vmatprep.subr.bf16.mxu0 %v4202_v42  ;;  %2749 = vmatprep.subr.bf16.mxu1 %v4204_v43  ;;  %v3872_v42 = vcombine.high %v88_v38, %v92_v39  ;;  %v4670_v43 = vmov 0  }
  0xf7   :  { %2586 = vmatpush1.bf16.msra.mxu0 %v4201_v48  ;;  %2750 = vmatpush1.bf16.msra.mxu1 %v4203_v49  ;;  %v96_v48 = vld [vmem:[#allocation5 + $0x58] sm:$0xff] }
  0xf8   :  { %2587 = vmatprep.subr.bf16.mxu0 %v4210_v50  ;;  %2751 = vmatprep.subr.bf16.mxu1 %v4212_v51  ;;  %v100_v49 = vld [vmem:[#allocation5 + $0x78] sm:$0xff]  ;;  %v3869_v50 = vcombine.low %v87_v35, %v91_v36  ;;  %v3871_v51 = vcombine.low %v88_v38, %v92_v39  ;;  %v143_v35 = vld [vmem:[#allocation5 + $0x1d0] sm:$0xff]  ;;  %v3917_v39 = vcombine.low %v135_v24, %v139_v26 }
  0xf9   :  { %v3880_v53 = vcombine.high %v96_v48, %v100_v49  ;;  %v147_v36 = vld [vmem:[#allocation5 + $0x1f0] sm:$0xff]  ;;  %v148_v38 = vld [vmem:[#allocation5 + $0x1f8] sm:$0xff] }
  0xfb   :  { %2588 = vmatpush1.bf16.msra.mxu0 %v4209_v56  ;;  %2752 = vmatpush1.bf16.msra.mxu1 %v4211_v58  ;;  %v104_v56 = vld [vmem:[#allocation5 + $0x98] sm:$0xff] }
  0xfc   :  { %2589 = vmatprep.subr.bf16.mxu0 %v4218_v59  ;;  %2753 = vmatprep.subr.bf16.mxu1 %v4220_v60  ;;  %v108_v58 = vld [vmem:[#allocation5 + $0xb8] sm:$0xff]  ;;  %v3877_v59 = vcombine.low %v95_v45, %v99_v46  ;;  %v3879_v60 = vcombine.low %v96_v48, %v100_v49  ;;  %v155_v45 = vld [vmem:[#allocation5 + $0x230] sm:$0xff]  ;;  %v3925_v49 = vcombine.low %v143_v35, %v147_v36 }
  0xfd   :  { %v3888_v62 = vcombine.high %v104_v56, %v108_v58  ;;  %v152_v46 = vld [vmem:[#allocation5 + $0x218] sm:$0xff] }
  0xfe   :  { %v156_v48 = vld [vmem:[#allocation5 + $0x238] sm:$0xff] }
  0xff   :  { %2590 = vmatpush1.bf16.msra.mxu0 %v4217_v1  ;;  %2754 = vmatpush1.bf16.msra.mxu1 %v4219_v2  ;;  %v112_v1 = vld [vmem:[#allocation5 + $0xd8] sm:$0xff] }
 0x100   :  { %2591 = vmatprep.subr.bf16.mxu0 %v4226_v3  ;;  %2755 = vmatprep.subr.bf16.mxu1 %v4228_v4  ;;  %v116_v2 = vld [vmem:[#allocation5 + $0xf8] sm:$0xff]  ;;  %v3885_v3 = vcombine.low %v103_v54, %v107_v55  ;;  %v3887_v4 = vcombine.low %v104_v56, %v108_v58  ;;  %v163_v54 = vld [vmem:[#allocation5 + $0x270] sm:$0xff]  ;;  %v3933_v58 = vcombine.low %v151_v44, %v155_v45 }
 0x101   :  { %v3896_v6 = vcombine.high %v112_v1, %v116_v2  ;;  %v160_v55 = vld [vmem:[#allocation5 + $0x258] sm:$0xff] }
 0x102   :  { %v164_v56 = vld [vmem:[#allocation5 + $0x278] sm:$0xff] }
 0x103   :  { %2592 = vmatpush1.bf16.msra.mxu0 %v4225_v9  ;;  %2756 = vmatpush1.bf16.msra.mxu1 %v4227_v10  ;;  %v120_v9 = vld [vmem:[#allocation5 + $0x118] sm:$0xff] }
 0x104   :  { %2593 = vmatprep.subr.bf16.mxu0 %v4234_v11  ;;  %2757 = vmatprep.subr.bf16.mxu1 %v4236_v13  ;;  %v124_v10 = vld [vmem:[#allocation5 + $0x138] sm:$0xff]  ;;  %v3893_v11 = vcombine.low %v111_v63, %v115_v0  ;;  %v3895_v13 = vcombine.low %v112_v1, %v116_v2  ;;  %v171_v63 = vld [vmem:[#allocation5 + $0x2b0] sm:$0xff] }
 0x105   :  { %v168_v0 = vld [vmem:[#allocation5 + $0x298] sm:$0xff] }
 0x106   :  { %v172_v1 = vld [vmem:[#allocation5 + $0x2b8] sm:$0xff] }
 0x107   :  { %2594 = vmatpush1.bf16.msra.mxu0 %v4233_v18  ;;  %2758 = vmatpush1.bf16.msra.mxu1 %v4235_v19  ;;  %v132_v18 = vld [vmem:[#allocation5 + $0x178] sm:$0xff]  ;;  %v3901_v19 = vcombine.low %v119_v7, %v123_v8  ;;  %v179_v7 = vld [vmem:[#allocation5 + $0x2f0] sm:$0xff] }
 0x108   :  { %2595 = vmatprep.subr.bf16.mxu0 %v4242_v20  ;;  %2759 = vmatprep.subr.bf16.mxu1 %v4244_v21  ;;  %v3903_v20 = vcombine.low %v120_v9, %v124_v10  ;;  %v3910_v21 = vcombine.high %v127_v15, %v131_v16  ;;  %v3912_v23 = vcombine.high %v128_v17, %v132_v18  ;;  %v176_v8 = vld [vmem:[#allocation5 + $0x2d8] sm:$0xff]  ;;  %v187_v15 = vld [vmem:[#allocation5 + $0x330] sm:$0xff] }
 0x109   :  { %v184_v16 = vld [vmem:[#allocation5 + $0x318] sm:$0xff] }
 0x10b   :  { %2596 = vmatpush1.bf16.msra.mxu0 %v4241_v28  ;;  %2760 = vmatpush1.bf16.msra.mxu1 %v4243_v30  ;;  %v140_v28 = vld [vmem:[#allocation5 + $0x1b8] sm:$0xff]  ;;  %v3911_v30 = vcombine.low %v128_v17, %v132_v18 }
 0x10c   :  { %2606 = vmatprep.subr.bf16.mxu0 %v4250_v31  ;;  %2770 = vmatprep.subr.bf16.mxu1 %v4252_v33  ;;  %v3918_v31 = vcombine.high %v135_v24, %v139_v26  ;;  %v3920_v33 = vcombine.high %v136_v27, %v140_v28  ;;  %v188_v17 = vld [vmem:[#allocation5 + $0x338] sm:$0xff]  ;;  %v195_v24 = vld [vmem:[#allocation5 + $0x370] sm:$0xff] }
 0x10d   :  { %v192_v26 = vld [vmem:[#allocation5 + $0x358] sm:$0xff] }
 0x10e   :  { %2598 = vmatmul.mubr.bf16.vlgmr.msra.gmra.mrb[0].mxu0 %v4770_v34  ;;  %2762 = vmatmul.mubr.bf16.vlgmr.msra.gmra.mrb[0].mxu1 %v4770_v34 }
 0x10f   :  { %2607 = vmatpush1.bf16.msra.mxu0 %v4249_v37  ;;  %2771 = vmatpush1.bf16.msra.mxu1 %v4251_v40  ;;  %v144_v37 = vld [vmem:[#allocation5 + $0x1d8] sm:$0xff]  ;;  %v3919_v40 = vcombine.low %v136_v27, %v140_v28 }
 0x110   :  { %2638 = vmatprep.mubr.bf16.mxu0 %v4670_v43  ;;  %2802 = vmatprep.mubr.bf16.mxu1 %v4670_v43  ;;  %v196_v27 = vld [vmem:[#allocation5 + $0x378] sm:$0xff] }
 0x111   :  { %2811 = vmatprep.subr.bf16.mxu0 %v3870_v41  ;;  %2975 = vmatprep.subr.bf16.mxu1 %v3872_v42  ;;  %v3926_v41 = vcombine.high %v143_v35, %v147_v36  ;;  %v3928_v42 = vcombine.high %v144_v37, %v148_v38  ;;  %v203_v35 = vld [vmem:[#allocation5 + $0x3b0] sm:$0xff]  ;;  %v200_v36 = vld [vmem:[#allocation5 + $0x398] sm:$0xff] }
 0x11a   :  { %4257 = vmatmul.mubr.msk.bf16.vlgmr.msra.gmra.mrb[0].mxu0 %vm2479_vm0, %v4776_v47  ;;  %4258 = vmatmul.mubr.msk.bf16.vlgmr.msra.gmra.mrb[0].mxu1 %vm2479_vm0, %v4776_v47 }
 0x11b   :  { %2812 = vmatpush1.bf16.msra.mxu0 %v3869_v50  ;;  %2976 = vmatpush1.bf16.msra.mxu1 %v3871_v51  ;;  %v3927_v50 = vcombine.low %v144_v37, %v148_v38  ;;  %v3934_v51 = vcombine.high %v151_v44, %v155_v45  ;;  %v204_v37 = vld [vmem:[#allocation5 + $0x3b8] sm:$0xff]  ;;  %v211_v44 = vld [vmem:[#allocation5 + $0x3f0] sm:$0xff] }
 0x11c   :  { %2813 = vmatprep.subr.bf16.mxu0 %v3878_v52  ;;  %2977 = vmatprep.subr.bf16.mxu1 %v3880_v53  ;;  %v3936_v52 = vcombine.high %v152_v46, %v156_v48  ;;  %v159_v53 = vld [vmem:[#allocation5 + $0x250] sm:$0xff]  ;;  %v208_v45 = vld [vmem:[#allocation5 + $0x3d8] sm:$0xff] }
 0x11d   :  { %2843 = vmatprep.mubr.bf16.mxu0 %v4750_v57  ;;  %3007 = vmatprep.mubr.bf16.mxu1 %v4750_v57  ;;  %v3904_v57 = vcombine.high %v120_v9, %v124_v10  ;;  %v3941_v2 = vcombine.low %v159_v53, %v163_v54  ;;  %v180_v9 = vld [vmem:[#allocation5 + $0x2f8] sm:$0xff] }
 0x11f   :  { %2814 = vmatpush1.bf16.msra.mxu0 %v3877_v59  ;;  %2978 = vmatpush1.bf16.msra.mxu1 %v3879_v60  ;;  %v3935_v59 = vcombine.low %v152_v46, %v156_v48  ;;  %v3942_v60 = vcombine.high %v159_v53, %v163_v54  ;;  %v212_v46 = vld [vmem:[#allocation5 + $0x3f8] sm:$0xff]  ;;  %v219_v53 = vld [vmem:[#allocation5 + $0x430] sm:$0xff] }
 0x120   :  { %2815 = vmatprep.subr.bf16.mxu0 %v3886_v61  ;;  %2979 = vmatprep.subr.bf16.mxu1 %v3888_v62  ;;  %v3944_v61 = vcombine.high %v160_v55, %v164_v56  ;;  %v167_v62 = vld [vmem:[#allocation5 + $0x290] sm:$0xff]  ;;  %v216_v54 = vld [vmem:[#allocation5 + $0x418] sm:$0xff] }
 0x121   :  { %v3949_v10 = vcombine.low %v167_v62, %v171_v63 }
 0x123   :  { %2816 = vmatpush1.bf16.msra.mxu0 %v3885_v3  ;;  %2980 = vmatpush1.bf16.msra.mxu1 %v3887_v4  ;;  %v3943_v3 = vcombine.low %v160_v55, %v164_v56  ;;  %v3950_v4 = vcombine.high %v167_v62, %v171_v63  ;;  %v220_v55 = vld [vmem:[#allocation5 + $0x438] sm:$0xff]  ;;  %v227_v62 = vld [vmem:[#allocation5 + $0x470] sm:$0xff] }
 0x124   :  { %2817 = vmatprep.subr.bf16.mxu0 %v3894_v5  ;;  %2981 = vmatprep.subr.bf16.mxu1 %v3896_v6  ;;  %v3952_v5 = vcombine.high %v168_v0, %v172_v1  ;;  %v175_v6 = vld [vmem:[#allocation5 + $0x2d0] sm:$0xff]  ;;  %v224_v63 = vld [vmem:[#allocation5 + $0x458] sm:$0xff] }
 0x125   :  { %v3957_v18 = vcombine.low %v175_v6, %v179_v7 }
 0x127   :  { %2818 = vmatpush1.bf16.msra.mxu0 %v3893_v11  ;;  %2982 = vmatpush1.bf16.msra.mxu1 %v3895_v13  ;;  %v3951_v11 = vcombine.low %v168_v0, %v172_v1  ;;  %v3958_v13 = vcombine.high %v175_v6, %v179_v7  ;;  %v228_v0 = vld [vmem:[#allocation5 + $0x478] sm:$0xff]  ;;  %v235_v6 = vld [vmem:[#allocation5 + $0x4b0] sm:$0xff] }
 0x128   :  { %2819 = vmatprep.subr.bf16.mxu0 %v3902_v14  ;;  %2983 = vmatprep.subr.bf16.mxu1 %v3904_v57  ;;  %v3960_v14 = vcombine.high %v176_v8, %v180_v9  ;;  %v183_v57 = vld [vmem:[#allocation5 + $0x310] sm:$0xff]  ;;  %v232_v7 = vld [vmem:[#allocation5 + $0x498] sm:$0xff] }
 0x129   :  { %v3965_v28 = vcombine.low %v183_v57, %v187_v15 }
 0x12b   :  { %2820 = vmatpush1.bf16.msra.mxu0 %v3901_v19  ;;  %2984 = vmatpush1.bf16.msra.mxu1 %v3903_v20  ;;  %v3959_v19 = vcombine.low %v176_v8, %v180_v9  ;;  %v3966_v20 = vcombine.high %v183_v57, %v187_v15  ;;  %v236_v8 = vld [vmem:[#allocation5 + $0x4b8] sm:$0xff]  ;;  %v243_v57 = vld [vmem:[#allocation5 + $0x4f0] sm:$0xff] }
 0x12c   :  { %2821 = vmatprep.subr.bf16.mxu0 %v3910_v21  ;;  %2985 = vmatprep.subr.bf16.mxu1 %v3912_v23  ;;  %v3968_v21 = vcombine.high %v184_v16, %v188_v17  ;;  %v191_v23 = vld [vmem:[#allocation5 + $0x350] sm:$0xff]  ;;  %v240_v15 = vld [vmem:[#allocation5 + $0x4d8] sm:$0xff] }
 0x12d   :  { %v3973_v38 = vcombine.low %v191_v23, %v195_v24 }
 0x12f   :  { %2822 = vmatpush1.bf16.msra.mxu0 %v3909_v29  ;;  %2986 = vmatpush1.bf16.msra.mxu1 %v3911_v30  ;;  %v3967_v29 = vcombine.low %v184_v16, %v188_v17  ;;  %v3974_v30 = vcombine.high %v191_v23, %v195_v24  ;;  %v244_v16 = vld [vmem:[#allocation5 + $0x4f8] sm:$0xff] }
 0x130   :  { %2823 = vmatprep.subr.bf16.mxu0 %v3918_v31  ;;  %2987 = vmatprep.subr.bf16.mxu1 %v3920_v33  ;;  %v3976_v31 = vcombine.high %v192_v26, %v196_v27  ;;  %v199_v33 = vld [vmem:[#allocation5 + $0x390] sm:$0xff]  ;;  %v248_v23 = vld [vmem:[#allocation5 + $0x518] sm:$0xff] }
 0x131   :  { %v3981_v48 = vcombine.low %v199_v33, %v203_v35  ;;  %v252_v24 = vld [vmem:[#allocation5 + $0x538] sm:$0xff] }
 0x133   :  { %2824 = vmatpush1.bf16.msra.mxu0 %v3917_v39  ;;  %2988 = vmatpush1.bf16.msra.mxu1 %v3919_v40  ;;  %v3975_v39 = vcombine.low %v192_v26, %v196_v27  ;;  %v3982_v40 = vcombine.high %v199_v33, %v203_v35  ;;  %v4023_v27 = vcombine.low %v240_v15, %v244_v16  ;;  %v260_v33 = vld [vmem:[#allocation5 + $0x578] sm:$0xff] }
 0x134   :  { %2825 = vmatprep.subr.bf16.mxu0 %v3926_v41  ;;  %2989 = vmatprep.subr.bf16.mxu1 %v3928_v42  ;;  %v3984_v41 = vcombine.high %v200_v36, %v204_v37  ;;  %v207_v42 = vld [vmem:[#allocation5 + $0x3d0] sm:$0xff] }
 0x135   :  { %v3989_v56 = vcombine.low %v207_v42, %v211_v44 }
 0x137   :  { %2826 = vmatpush1.bf16.msra.mxu0 %v3925_v49  ;;  %2990 = vmatpush1.bf16.msra.mxu1 %v3927_v50  ;;  %v3983_v49 = vcombine.low %v200_v36, %v204_v37  ;;  %v3990_v50 = vcombine.high %v207_v42, %v211_v44  ;;  %v4031_v36 = vcombine.low %v248_v23, %v252_v24  ;;  %v268_v42 = vld [vmem:[#allocation5 + $0x5b8] sm:$0xff] }
 0x138   :  { %2827 = vmatprep.subr.bf16.mxu0 %v3934_v51  ;;  %2991 = vmatprep.subr.bf16.mxu1 %v3936_v52  ;;  %v3992_v51 = vcombine.high %v208_v45, %v212_v46  ;;  %v215_v52 = vld [vmem:[#allocation5 + $0x410] sm:$0xff] }
 0x139   :  { %v3997_v1 = vcombine.low %v215_v52, %v219_v53 }
 0x13b   :  { %2828 = vmatpush1.bf16.msra.mxu0 %v3933_v58  ;;  %2992 = vmatpush1.bf16.msra.mxu1 %v3935_v59  ;;  %v3991_v58 = vcombine.low %v208_v45, %v212_v46  ;;  %v3998_v59 = vcombine.high %v215_v52, %v219_v53  ;;  %v276_v52 = vld [vmem:[#allocation5 + $0x5f8] sm:$0xff] }
 0x13c   :  { %2829 = vmatprep.subr.bf16.mxu0 %v3942_v60  ;;  %2993 = vmatprep.subr.bf16.mxu1 %v3944_v61  ;;  %v4000_v60 = vcombine.high %v216_v54, %v220_v55  ;;  %v223_v61 = vld [vmem:[#allocation5 + $0x450] sm:$0xff] }
 0x13d   :  { %v4005_v9 = vcombine.low %v223_v61, %v227_v62 }
 0x13f   :  { %2830 = vmatpush1.bf16.msra.mxu0 %v3941_v2  ;;  %2994 = vmatpush1.bf16.msra.mxu1 %v3943_v3  ;;  %v3999_v2 = vcombine.low %v216_v54, %v220_v55  ;;  %v4006_v3 = vcombine.high %v223_v61, %v227_v62  ;;  %v284_v61 = vld [vmem:[#allocation5 + $0x638] sm:$0xff] }
 0x140   :  { %2831 = vmatprep.subr.bf16.mxu0 %v3950_v4  ;;  %2995 = vmatprep.subr.bf16.mxu1 %v3952_v5  ;;  %v4008_v4 = vcombine.high %v224_v63, %v228_v0  ;;  %v231_v5 = vld [vmem:[#allocation5 + $0x490] sm:$0xff] }
 0x141   :  { %v4013_v17 = vcombine.low %v231_v5, %v235_v6 }
 0x143   :  { %2832 = vmatpush1.bf16.msra.mxu0 %v3949_v10  ;;  %2996 = vmatpush1.bf16.msra.mxu1 %v3951_v11  ;;  %v4007_v10 = vcombine.low %v224_v63, %v228_v0  ;;  %v4014_v11 = vcombine.high %v231_v5, %v235_v6  ;;  %v292_v5 = vld [vmem:[#allocation5 + $0x678] sm:$0xff] }
 0x144   :  { %2833 = vmatprep.subr.bf16.mxu0 %v3958_v13  ;;  %2997 = vmatprep.subr.bf16.mxu1 %v3960_v14  ;;  %v4016_v13 = vcombine.high %v232_v7, %v236_v8  ;;  %v239_v14 = vld [vmem:[#allocation5 + $0x4d0] sm:$0xff] }
 0x145   :  { %v4021_v26 = vcombine.low %v239_v14, %v243_v57 }
 0x147   :  { %2834 = vmatpush1.bf16.msra.mxu0 %v3957_v18  ;;  %2998 = vmatpush1.bf16.msra.mxu1 %v3959_v19  ;;  %v4022_v18 = vcombine.high %v239_v14, %v243_v57  ;;  %v4024_v19 = vcombine.high %v240_v15, %v244_v16  ;;  %v300_v14 = vld [vmem:[#allocation5 + $0x6b8] sm:$0xff] }
 0x148   :  { %2835 = vmatprep.subr.bf16.mxu0 %v3966_v20  ;;  %2999 = vmatprep.subr.bf16.mxu1 %v3968_v21  ;;  %v247_v20 = vld [vmem:[#allocation5 + $0x510] sm:$0xff] }
 0x149   :  { %v251_v21 = vld [vmem:[#allocation5 + $0x530] sm:$0xff] }
 0x14a   :  { %v4029_v35 = vcombine.low %v247_v20, %v251_v21 }
 0x14b   :  { %2836 = vmatpush1.bf16.msra.mxu0 %v3965_v28  ;;  %3000 = vmatpush1.bf16.msra.mxu1 %v3967_v29  ;;  %v4030_v28 = vcombine.high %v247_v20, %v251_v21  ;;  %v255_v29 = vld [vmem:[#allocation5 + $0x550] sm:$0xff]  ;;  %v308_v20 = vld [vmem:[#allocation5 + $0x6f8] sm:$0xff] }
 0x14c   :  { %2837 = vmatprep.subr.bf16.mxu0 %v3974_v30  ;;  %3001 = vmatprep.subr.bf16.mxu1 %v3976_v31  ;;  %v259_v30 = vld [vmem:[#allocation5 + $0x570] sm:$0xff]  ;;  %v256_v31 = vld [vmem:[#allocation5 + $0x558] sm:$0xff] }
 0x14d   :  { %v4038_v37 = vcombine.high %v255_v29, %v259_v30  ;;  %v4037_v44 = vcombine.low %v255_v29, %v259_v30  ;;  %v4039_v45 = vcombine.low %v256_v31, %v260_v33  ;;  %v316_v29 = vld [vmem:[#allocation5 + $0x738] sm:$0xff] }
 0x14f   :  { %2838 = vmatpush1.bf16.msra.mxu0 %v3973_v38  ;;  %3002 = vmatpush1.bf16.msra.mxu1 %v3975_v39  ;;  %v4040_v38 = vcombine.high %v256_v31, %v260_v33  ;;  %v263_v39 = vld [vmem:[#allocation5 + $0x590] sm:$0xff] }
 0x150   :  { %2839 = vmatprep.subr.bf16.mxu0 %v3982_v40  ;;  %3003 = vmatprep.subr.bf16.mxu1 %v3984_v41  ;;  %v267_v40 = vld [vmem:[#allocation5 + $0x5b0] sm:$0xff]  ;;  %v264_v41 = vld [vmem:[#allocation5 + $0x598] sm:$0xff] }
 0x151   :  { %v4046_v46 = vcombine.high %v263_v39, %v267_v40  ;;  %v4045_v53 = vcombine.low %v263_v39, %v267_v40  ;;  %v4047_v54 = vcombine.low %v264_v41, %v268_v42  ;;  %v324_v39 = vld [vmem:[#allocation5 + $0x778] sm:$0xff] }
 0x153   :  { %2840 = vmatpush1.bf16.msra.mxu0 %v3981_v48  ;;  %3004 = vmatpush1.bf16.msra.mxu1 %v3983_v49  ;;  %v4048_v48 = vcombine.high %v264_v41, %v268_v42  ;;  %v271_v49 = vld [vmem:[#allocation5 + $0x5d0] sm:$0xff] }
 0x154   :  { %2841 = vmatprep.subr.bf16.mxu0 %v3990_v50  ;;  %3005 = vmatprep.subr.bf16.mxu1 %v3992_v51  ;;  %v275_v50 = vld [vmem:[#allocation5 + $0x5f0] sm:$0xff]  ;;  %v272_v51 = vld [vmem:[#allocation5 + $0x5d8] sm:$0xff] }
 0x155   :  { %v4054_v55 = vcombine.high %v271_v49, %v275_v50  ;;  %v4053_v62 = vcombine.low %v271_v49, %v275_v50  ;;  %v4055_v63 = vcombine.low %v272_v51, %v276_v52  ;;  %v332_v49 = vld [vmem:[#allocation5 + $0x7b8] sm:$0xff] }
 0x157   :  { %2842 = vmatpush1.bf16.msra.mxu0 %v3989_v56  ;;  %3006 = vmatpush1.bf16.msra.mxu1 %v3991_v58  ;;  %v4056_v56 = vcombine.high %v272_v51, %v276_v52  ;;  %v279_v58 = vld [vmem:[#allocation5 + $0x610] sm:$0xff] }
 0x158   :  { %2852 = vmatprep.subr.bf16.mxu0 %v3998_v59  ;;  %3016 = vmatprep.subr.bf16.mxu1 %v4000_v60  ;;  %v283_v59 = vld [vmem:[#allocation5 + $0x630] sm:$0xff]  ;;  %v280_v60 = vld [vmem:[#allocation5 + $0x618] sm:$0xff] }
 0x159   :  { %v4062_v0 = vcombine.high %v279_v58, %v283_v59  ;;  %v4061_v6 = vcombine.low %v279_v58, %v283_v59  ;;  %v340_v58 = vld [vmem:[#allocation5 + $0x7f8] sm:$0xff] }
 0x15a   :  { %2844 = vmatmul.mubr.bf16.vlgmr.msra.gmra.mrb[4].mxu0 %v4754_v12  ;;  %3008 = vmatmul.mubr.bf16.vlgmr.msra.gmra.mrb[4].mxu1 %v4754_v12  ;;  %v4015_v12 = vcombine.low %v232_v7, %v236_v8  ;;  %v4063_v7 = vcombine.low %v280_v60, %v284_v61 }
 0x15b   :  { %2853 = vmatpush1.bf16.msra.mxu0 %v3997_v1  ;;  %3017 = vmatpush1.bf16.msra.mxu1 %v3999_v2  ;;  %v4064_v1 = vcombine.high %v280_v60, %v284_v61  ;;  %v287_v2 = vld [vmem:[#allocation5 + $0x650] sm:$0xff] }
 0x15c   :  { %2854 = vmatprep.subr.bf16.mxu0 %v4006_v3  ;;  %3018 = vmatprep.subr.bf16.mxu1 %v4008_v4  ;;  %v291_v3 = vld [vmem:[#allocation5 + $0x670] sm:$0xff]  ;;  %v288_v4 = vld [vmem:[#allocation5 + $0x658] sm:$0xff] }
 0x15d   :  { %2884 = vmatprep.mubr.bf16.mxu0 %v4756_v22  ;;  %3048 = vmatprep.mubr.bf16.mxu1 %v4756_v22  ;;  %v4032_v22 = vcombine.high %v248_v23, %v252_v24  ;;  %v4070_v8 = vcombine.high %v287_v2, %v291_v3  ;;  %v4069_v57 = vcombine.low %v287_v2, %v291_v3  ;;  %v348_v2 = vld [vmem:[#allocation5 + $0x838] sm:$0xff] }
 0x15e   :  { %v4071_v15 = vcombine.low %v288_v4, %v292_v5 }
 0x15f   :  { %2855 = vmatpush1.bf16.msra.mxu0 %v4005_v9  ;;  %3019 = vmatpush1.bf16.msra.mxu1 %v4007_v10  ;;  %v4072_v9 = vcombine.high %v288_v4, %v292_v5  ;;  %v295_v10 = vld [vmem:[#allocation5 + $0x690] sm:$0xff] }
 0x160   :  { %2856 = vmatprep.subr.bf16.mxu0 %v4014_v11  ;;  %3020 = vmatprep.subr.bf16.mxu1 %v4016_v13  ;;  %v299_v11 = vld [vmem:[#allocation5 + $0x6b0] sm:$0xff]  ;;  %v296_v13 = vld [vmem:[#allocation5 + $0x698] sm:$0xff] }
 0x161   :  { %v4078_v16 = vcombine.high %v295_v10, %v299_v11  ;;  %v4077_v21 = vcombine.low %v295_v10, %v299_v11  ;;  %v4079_v23 = vcombine.low %v296_v13, %v300_v14  ;;  %v356_v10 = vld [vmem:[#allocation5 + $0x878] sm:$0xff] }
 0x163   :  { %2857 = vmatpush1.bf16.msra.mxu0 %v4013_v17  ;;  %3021 = vmatpush1.bf16.msra.mxu1 %v4015_v12  ;;  %v4080_v17 = vcombine.high %v296_v13, %v300_v14  ;;  %v303_v12 = vld [vmem:[#allocation5 + $0x6d0] sm:$0xff] }
 0x164   :  { %2858 = vmatprep.subr.bf16.mxu0 %v4022_v18  ;;  %3022 = vmatprep.subr.bf16.mxu1 %v4024_v19  ;;  %v307_v18 = vld [vmem:[#allocation5 + $0x6f0] sm:$0xff]  ;;  %v304_v19 = vld [vmem:[#allocation5 + $0x6d8] sm:$0xff] }
 0x165   :  { %v4086_v24 = vcombine.high %v303_v12, %v307_v18  ;;  %v4085_v30 = vcombine.low %v303_v12, %v307_v18  ;;  %v4087_v31 = vcombine.low %v304_v19, %v308_v20  ;;  %v364_v12 = vld [vmem:[#allocation5 + $0x8b8] sm:$0xff] }
 0x167   :  { %2859 = vmatpush1.bf16.msra.mxu0 %v4021_v26  ;;  %3023 = vmatpush1.bf16.msra.mxu1 %v4023_v27  ;;  %v4088_v26 = vcombine.high %v304_v19, %v308_v20  ;;  %v311_v27 = vld [vmem:[#allocation5 + $0x710] sm:$0xff] }
 0x168   :  { %2860 = vmatprep.subr.bf16.mxu0 %v4030_v28  ;;  %3024 = vmatprep.subr.bf16.mxu1 %v4032_v22  ;;  %v315_v28 = vld [vmem:[#allocation5 + $0x730] sm:$0xff]  ;;  %v312_v22 = vld [vmem:[#allocation5 + $0x718] sm:$0xff] }
 0x169   :  { %v4094_v33 = vcombine.high %v311_v27, %v315_v28  ;;  %v4093_v40 = vcombine.low %v311_v27, %v315_v28  ;;  %v4095_v41 = vcombine.low %v312_v22, %v316_v29  ;;  %v372_v27 = vld [vmem:[#allocation5 + $0x8f8] sm:$0xff] }
 0x16b   :  { %2861 = vmatpush1.bf16.msra.mxu0 %v4029_v35  ;;  %3025 = vmatpush1.bf16.msra.mxu1 %v4031_v36  ;;  %v4096_v35 = vcombine.high %v312_v22, %v316_v29  ;;  %v319_v36 = vld [vmem:[#allocation5 + $0x750] sm:$0xff] }
 0x16c   :  { %2862 = vmatprep.subr.bf16.mxu0 %v4038_v37  ;;  %3026 = vmatprep.subr.bf16.mxu1 %v4040_v38  ;;  %v323_v37 = vld [vmem:[#allocation5 + $0x770] sm:$0xff]  ;;  %v320_v38 = vld [vmem:[#allocation5 + $0x758] sm:$0xff] }
 0x16d   :  { %v4102_v42 = vcombine.high %v319_v36, %v323_v37  ;;  %v4101_v50 = vcombine.low %v319_v36, %v323_v37  ;;  %v4103_v51 = vcombine.low %v320_v38, %v324_v39 }
 0x16f   :  { %2863 = vmatpush1.bf16.msra.mxu0 %v4037_v44  ;;  %3027 = vmatpush1.bf16.msra.mxu1 %v4039_v45  ;;  %v4104_v44 = vcombine.high %v320_v38, %v324_v39  ;;  %v327_v45 = vld [vmem:[#allocation5 + $0x790] sm:$0xff] }
 0x170   :  { %2864 = vmatprep.subr.bf16.mxu0 %v4046_v46  ;;  %3028 = vmatprep.subr.bf16.mxu1 %v4048_v48  ;;  %v331_v46 = vld [vmem:[#allocation5 + $0x7b0] sm:$0xff]  ;;  %v328_v48 = vld [vmem:[#allocation5 + $0x798] sm:$0xff] }
 0x171   :  { %v4110_v52 = vcombine.high %v327_v45, %v331_v46  ;;  %v4109_v59 = vcombine.low %v327_v45, %v331_v46  ;;  %v4111_v60 = vcombine.low %v328_v48, %v332_v49  ;;  %v383_v39 = vld [vmem:[#allocation5 + $0x950] sm:$0xff] }
 0x173   :  { %2865 = vmatpush1.bf16.msra.mxu0 %v4045_v53  ;;  %3029 = vmatpush1.bf16.msra.mxu1 %v4047_v54  ;;  %v4112_v53 = vcombine.high %v328_v48, %v332_v49  ;;  %v335_v54 = vld [vmem:[#allocation5 + $0x7d0] sm:$0xff] }
 0x174   :  { %2866 = vmatprep.subr.bf16.mxu0 %v4054_v55  ;;  %3030 = vmatprep.subr.bf16.mxu1 %v4056_v56  ;;  %v339_v55 = vld [vmem:[#allocation5 + $0x7f0] sm:$0xff]  ;;  %v336_v56 = vld [vmem:[#allocation5 + $0x7d8] sm:$0xff] }
 0x175   :  { %v4118_v61 = vcombine.high %v335_v54, %v339_v55  ;;  %v4117_v3 = vcombine.low %v335_v54, %v339_v55  ;;  %v4119_v4 = vcombine.low %v336_v56, %v340_v58  ;;  %v391_v49 = vld [vmem:[#allocation5 + $0x990] sm:$0xff] }
 0x177   :  { %2867 = vmatpush1.bf16.msra.mxu0 %v4053_v62  ;;  %3031 = vmatpush1.bf16.msra.mxu1 %v4055_v63  ;;  %v4120_v62 = vcombine.high %v336_v56, %v340_v58  ;;  %v343_v63 = vld [vmem:[#allocation5 + $0x810] sm:$0xff] }
 0x178   :  { %2868 = vmatprep.subr.bf16.mxu0 %v4062_v0  ;;  %3032 = vmatprep.subr.bf16.mxu1 %v4064_v1  ;;  %v347_v0 = vld [vmem:[#allocation5 + $0x830] sm:$0xff]  ;;  %v344_v1 = vld [vmem:[#allocation5 + $0x818] sm:$0xff] }
 0x179   :  { %v4126_v5 = vcombine.high %v343_v63, %v347_v0  ;;  %v4125_v11 = vcombine.low %v343_v63, %v347_v0  ;;  %v4127_v13 = vcombine.low %v344_v1, %v348_v2  ;;  %v399_v58 = vld [vmem:[#allocation5 + $0x9d0] sm:$0xff] }
 0x17b   :  { %2869 = vmatpush1.bf16.msra.mxu0 %v4061_v6  ;;  %3033 = vmatpush1.bf16.msra.mxu1 %v4063_v7  ;;  %v4128_v6 = vcombine.high %v344_v1, %v348_v2  ;;  %v351_v7 = vld [vmem:[#allocation5 + $0x850] sm:$0xff] }
 0x17c   :  { %2870 = vmatprep.subr.bf16.mxu0 %v4070_v8  ;;  %3034 = vmatprep.subr.bf16.mxu1 %v4072_v9  ;;  %v355_v8 = vld [vmem:[#allocation5 + $0x870] sm:$0xff]  ;;  %v352_v9 = vld [vmem:[#allocation5 + $0x858] sm:$0xff] }
 0x17d   :  { %v4134_v14 = vcombine.high %v351_v7, %v355_v8  ;;  %v4133_v18 = vcombine.low %v351_v7, %v355_v8  ;;  %v4135_v19 = vcombine.low %v352_v9, %v356_v10  ;;  %v407_v2 = vld [vmem:[#allocation5 + $0xa10] sm:$0xff] }
 0x17f   :  { %2871 = vmatpush1.bf16.msra.mxu0 %v4069_v57  ;;  %3035 = vmatpush1.bf16.msra.mxu1 %v4071_v15  ;;  %v4136_v57 = vcombine.high %v352_v9, %v356_v10  ;;  %v359_v15 = vld [vmem:[#allocation5 + $0x890] sm:$0xff] }
 0x180   :  { %2872 = vmatprep.subr.bf16.mxu0 %v4078_v16  ;;  %3036 = vmatprep.subr.bf16.mxu1 %v4080_v17  ;;  %v363_v16 = vld [vmem:[#allocation5 + $0x8b0] sm:$0xff]  ;;  %v360_v17 = vld [vmem:[#allocation5 + $0x898] sm:$0xff] }
 0x181   :  { %v4142_v20 = vcombine.high %v359_v15, %v363_v16  ;;  %v4141_v28 = vcombine.low %v359_v15, %v363_v16  ;;  %v415_v10 = vld [vmem:[#allocation5 + $0xa50] sm:$0xff] }
 0x183   :  { %2873 = vmatpush1.bf16.msra.mxu0 %v4077_v21  ;;  %3037 = vmatpush1.bf16.msra.mxu1 %v4079_v23  ;;  %v4144_v21 = vcombine.high %v360_v17, %v364_v12  ;;  %v367_v23 = vld [vmem:[#allocation5 + $0x8d0] sm:$0xff] }
 0x184   :  { %2874 = vmatprep.subr.bf16.mxu0 %v4086_v24  ;;  %3038 = vmatprep.subr.bf16.mxu1 %v4088_v26  ;;  %v371_v24 = vld [vmem:[#allocation5 + $0x8f0] sm:$0xff]  ;;  %v368_v26 = vld [vmem:[#allocation5 + $0x8d8] sm:$0xff] }
 0x185   :  { %v4150_v22 = vcombine.high %v367_v23, %v371_v24  ;;  %v4152_v29 = vcombine.high %v368_v26, %v372_v27  ;;  %v4149_v36 = vcombine.low %v367_v23, %v371_v24  ;;  %v4151_v37 = vcombine.low %v368_v26, %v372_v27  ;;  %v431_v27 = vld [vmem:[#allocation5 + $0xad0] sm:$0xff] }
 0x187   :  { %2875 = vmatpush1.bf16.msra.mxu0 %v4085_v30  ;;  %3039 = vmatpush1.bf16.msra.mxu1 %v4087_v31  ;;  %v375_v30 = vld [vmem:[#allocation5 + $0x910] sm:$0xff] }
 0x188   :  { %2876 = vmatprep.subr.bf16.mxu0 %v4094_v33  ;;  %3040 = vmatprep.subr.bf16.mxu1 %v4096_v35  ;;  %v379_v31 = vld [vmem:[#allocation5 + $0x930] sm:$0xff]  ;;  %v376_v33 = vld [vmem:[#allocation5 + $0x918] sm:$0xff] }
 0x189   :  { %v380_v35 = vld [vmem:[#allocation5 + $0x938] sm:$0xff]  ;;  %v4158_v38 = vcombine.high %v375_v30, %v379_v31 }
 0x18a   :  { %v4159_v45 = vcombine.low %v376_v33, %v380_v35 }
 0x18b   :  { %2877 = vmatpush1.bf16.msra.mxu0 %v4093_v40  ;;  %3041 = vmatpush1.bf16.msra.mxu1 %v4095_v41  ;;  %v387_v40 = vld [vmem:[#allocation5 + $0x970] sm:$0xff]  ;;  %v384_v41 = vld [vmem:[#allocation5 + $0x958] sm:$0xff] }
 0x18c   :  { %2878 = vmatprep.subr.bf16.mxu0 %v4102_v42  ;;  %3042 = vmatprep.subr.bf16.mxu1 %v4104_v44  ;;  %v388_v42 = vld [vmem:[#allocation5 + $0x978] sm:$0xff]  ;;  %v4157_v44 = vcombine.low %v375_v30, %v379_v31  ;;  %v4166_v46 = vcombine.high %v383_v39, %v387_v40 }
 0x18d   :  { %v4168_v48 = vcombine.high %v384_v41, %v388_v42  ;;  %v4167_v54 = vcombine.low %v384_v41, %v388_v42  ;;  %v447_v42 = vld [vmem:[#allocation5 + $0xb50] sm:$0xff] }
 0x18f   :  { %2879 = vmatpush1.bf16.msra.mxu0 %v4101_v50  ;;  %3043 = vmatpush1.bf16.msra.mxu1 %v4103_v51  ;;  %v395_v50 = vld [vmem:[#allocation5 + $0x9b0] sm:$0xff]  ;;  %v392_v51 = vld [vmem:[#allocation5 + $0x998] sm:$0xff] }
 0x190   :  { %2880 = vmatprep.subr.bf16.mxu0 %v4110_v52  ;;  %3044 = vmatprep.subr.bf16.mxu1 %v4112_v53  ;;  %v396_v52 = vld [vmem:[#allocation5 + $0x9b8] sm:$0xff]  ;;  %v4165_v53 = vcombine.low %v383_v39, %v387_v40  ;;  %v4174_v55 = vcombine.high %v391_v49, %v395_v50 }
 0x191   :  { %v4176_v56 = vcombine.high %v392_v51, %v396_v52  ;;  %v4175_v63 = vcombine.low %v392_v51, %v396_v52  ;;  %v455_v52 = vld [vmem:[#allocation5 + $0xb90] sm:$0xff] }
 0x193   :  { %2881 = vmatpush1.bf16.msra.mxu0 %v4109_v59  ;;  %3045 = vmatpush1.bf16.msra.mxu1 %v4111_v60  ;;  %v403_v59 = vld [vmem:[#allocation5 + $0x9f0] sm:$0xff]  ;;  %v400_v60 = vld [vmem:[#allocation5 + $0x9d8] sm:$0xff] }
 0x194   :  { %2882 = vmatprep.subr.bf16.mxu0 %v4118_v61  ;;  %3046 = vmatprep.subr.bf16.mxu1 %v4120_v62  ;;  %v404_v61 = vld [vmem:[#allocation5 + $0x9f8] sm:$0xff]  ;;  %v4173_v62 = vcombine.low %v391_v49, %v395_v50  ;;  %v4182_v0 = vcombine.high %v399_v58, %v403_v59 }
 0x195   :  { %v4184_v1 = vcombine.high %v400_v60, %v404_v61  ;;  %v4183_v7 = vcombine.low %v400_v60, %v404_v61  ;;  %v463_v61 = vld [vmem:[#allocation5 + $0xbd0] sm:$0xff] }
 0x197   :  { %2883 = vmatpush1.bf16.msra.mxu0 %v4117_v3  ;;  %3047 = vmatpush1.bf16.msra.mxu1 %v4119_v4  ;;  %v411_v3 = vld [vmem:[#allocation5 + $0xa30] sm:$0xff]  ;;  %v408_v4 = vld [vmem:[#allocation5 + $0xa18] sm:$0xff] }
 0x198   :  { %2893 = vmatprep.subr.bf16.mxu0 %v4126_v5  ;;  %3057 = vmatprep.subr.bf16.mxu1 %v4128_v6  ;;  %v412_v5 = vld [vmem:[#allocation5 + $0xa38] sm:$0xff]  ;;  %v4181_v6 = vcombine.low %v399_v58, %v403_v59  ;;  %v4190_v8 = vcombine.high %v407_v2, %v411_v3 }
 0x199   :  { %v4192_v9 = vcombine.high %v408_v4, %v412_v5  ;;  %v4191_v15 = vcombine.low %v408_v4, %v412_v5  ;;  %v471_v5 = vld [vmem:[#allocation5 + $0xc10] sm:$0xff] }
 0x19a   :  { %2885 = vmatmul.mubr.bf16.vlgmr.msra.gmra.mrb[4].mxu0 %v4762_v25  ;;  %3049 = vmatmul.mubr.bf16.vlgmr.msra.gmra.mrb[4].mxu1 %v4762_v25  ;;  %v4143_v25 = vcombine.low %v360_v17, %v364_v12  ;;  %v423_v12 = vld [vmem:[#allocation5 + $0xa90] sm:$0xff] }
 0x19b   :  { %2894 = vmatpush1.bf16.msra.mxu0 %v4125_v11  ;;  %3058 = vmatpush1.bf16.msra.mxu1 %v4127_v13  ;;  %v419_v11 = vld [vmem:[#allocation5 + $0xa70] sm:$0xff]  ;;  %v416_v13 = vld [vmem:[#allocation5 + $0xa58] sm:$0xff] }
 0x19c   :  { %2895 = vmatprep.subr.bf16.mxu0 %v4134_v14  ;;  %3059 = vmatprep.subr.bf16.mxu1 %v4136_v57  ;;  %v420_v14 = vld [vmem:[#allocation5 + $0xa78] sm:$0xff]  ;;  %v4189_v57 = vcombine.low %v407_v2, %v411_v3  ;;  %v4198_v16 = vcombine.high %v415_v10, %v419_v11 }
 0x19d   :  { %2925 = vmatprep.mubr.bf16.mxu0 %v4764_v32  ;;  %3089 = vmatprep.mubr.bf16.mxu1 %v4764_v32  ;;  %v4160_v32 = vcombine.high %v376_v33, %v380_v35  ;;  %v4200_v17 = vcombine.high %v416_v13, %v420_v14  ;;  %v4199_v23 = vcombine.low %v416_v13, %v420_v14  ;;  %v439_v35 = vld [vmem:[#allocation5 + $0xb10] sm:$0xff] }
 0x19f   :  { %2896 = vmatpush1.bf16.msra.mxu0 %v4133_v18  ;;  %3060 = vmatpush1.bf16.msra.mxu1 %v4135_v19  ;;  %v427_v18 = vld [vmem:[#allocation5 + $0xab0] sm:$0xff]  ;;  %v424_v19 = vld [vmem:[#allocation5 + $0xa98] sm:$0xff] }
 0x1a0   :  { %2897 = vmatprep.subr.bf16.mxu0 %v4142_v20  ;;  %3061 = vmatprep.subr.bf16.mxu1 %v4144_v21  ;;  %v428_v20 = vld [vmem:[#allocation5 + $0xab8] sm:$0xff]  ;;  %v4197_v21 = vcombine.low %v415_v10, %v419_v11  ;;  %v4206_v24 = vcombine.high %v423_v12, %v427_v18 }
 0x1a1   :  { %v4208_v26 = vcombine.high %v424_v19, %v428_v20  ;;  %v4207_v30 = vcombine.low %v424_v19, %v428_v20  ;;  %v4481_v19 = vld [vmem:[%s5030_s3 + $0x80] sm:$0xff]   ;;  %v4484_v20 = vld [vmem:[%s5030_s3 + $0x8] sm:$0xff]  }
 0x1a3   :  { %2898 = vmatpush1.bf16.msra.mxu0 %v4141_v28  ;;  %3062 = vmatpush1.bf16.msra.mxu1 %v4143_v25  ;;  %v435_v28 = vld [vmem:[#allocation5 + $0xaf0] sm:$0xff]  ;;  %v432_v25 = vld [vmem:[#allocation5 + $0xad8] sm:$0xff] }
 0x1a4   :  { %2899 = vmatprep.subr.bf16.mxu0 %v4150_v22  ;;  %3063 = vmatprep.subr.bf16.mxu1 %v4152_v29  ;;  %v436_v22 = vld [vmem:[#allocation5 + $0xaf8] sm:$0xff]  ;;  %v4205_v29 = vcombine.low %v423_v12, %v427_v18  ;;  %v4214_v31 = vcombine.high %v431_v27, %v435_v28  ;;  %v4480_v12 = vld [vmem:[%s5030_s3] sm:$0xff]  }
 0x1a5   :  { %v4216_v33 = vcombine.high %v432_v25, %v436_v22  ;;  %v4215_v39 = vcombine.low %v432_v25, %v436_v22  ;;  %v4489_v22 = vld [vmem:[%s5030_s3 + $0x90] sm:$0xff]  }
 0x1a7   :  { %2900 = vmatpush1.bf16.msra.mxu0 %v4149_v36  ;;  %3064 = vmatpush1.bf16.msra.mxu1 %v4151_v37  ;;  %v443_v36 = vld [vmem:[#allocation5 + $0xb30] sm:$0xff]  ;;  %v440_v37 = vld [vmem:[#allocation5 + $0xb18] sm:$0xff] }
 0x1a8   :  { %2901 = vmatprep.subr.bf16.mxu0 %v4158_v38  ;;  %3065 = vmatprep.subr.bf16.mxu1 %v4160_v32  ;;  %v444_v38 = vld [vmem:[#allocation5 + $0xb38] sm:$0xff]  ;;  %v4213_v32 = vcombine.low %v431_v27, %v435_v28  ;;  %v4222_v40 = vcombine.high %v439_v35, %v443_v36 }
 0x1a9   :  { %v4224_v41 = vcombine.high %v440_v37, %v444_v38  ;;  %v4223_v49 = vcombine.low %v440_v37, %v444_v38  ;;  %v4487_v27 = vld [vmem:[%s5030_s3 + $0xd0] sm:$0xff]  }
 0x1aa   :  { %v4488_v28 = vld [vmem:[%s5030_s3 + $0x10] sm:$0xff]  }
 0x1ab   :  { %2902 = vmatpush1.bf16.msra.mxu0 %v4157_v44  ;;  %3066 = vmatpush1.bf16.msra.mxu1 %v4159_v45  ;;  %v451_v44 = vld [vmem:[#allocation5 + $0xb70] sm:$0xff]  ;;  %v448_v45 = vld [vmem:[#allocation5 + $0xb58] sm:$0xff] }
 0x1ac   :  { %2903 = vmatprep.subr.bf16.mxu0 %v4166_v46  ;;  %3067 = vmatprep.subr.bf16.mxu1 %v4168_v48  ;;  %v452_v46 = vld [vmem:[#allocation5 + $0xb78] sm:$0xff]  ;;  %v4221_v48 = vcombine.low %v439_v35, %v443_v36  ;;  %v4230_v50 = vcombine.high %v447_v42, %v451_v44 }
 0x1ad   :  { %v4232_v51 = vcombine.high %v448_v45, %v452_v46  ;;  %v4231_v58 = vcombine.low %v448_v45, %v452_v46  ;;  %v4494_v45 = vld [vmem:[%s5030_s3 + $0x60] sm:$0xff]  }
 0x1af   :  { %2904 = vmatpush1.bf16.msra.mxu0 %v4165_v53  ;;  %3068 = vmatpush1.bf16.msra.mxu1 %v4167_v54  ;;  %v459_v53 = vld [vmem:[#allocation5 + $0xbb0] sm:$0xff]  ;;  %v456_v54 = vld [vmem:[#allocation5 + $0xb98] sm:$0xff] }
 0x1b0   :  { %2905 = vmatprep.subr.bf16.mxu0 %v4174_v55  ;;  %3069 = vmatprep.subr.bf16.mxu1 %v4176_v56  ;;  %v460_v55 = vld [vmem:[#allocation5 + $0xbb8] sm:$0xff]  ;;  %v4229_v56 = vcombine.low %v447_v42, %v451_v44  ;;  %v4238_v59 = vcombine.high %v455_v52, %v459_v53  ;;  %v4493_v44 = vld [vmem:[%s5030_s3 + $0x98] sm:$0xff]  }
 0x1b1   :  { %v4240_v60 = vcombine.high %v456_v54, %v460_v55  ;;  %v4239_v2 = vcombine.low %v456_v54, %v460_v55  ;;  %v4497_v55 = vld [vmem:[%s5030_s3 + $0xa0] sm:$0xff]  }
 0x1b3   :  { %2906 = vmatpush1.bf16.msra.mxu0 %v4173_v62  ;;  %3070 = vmatpush1.bf16.msra.mxu1 %v4175_v63  ;;  %v467_v62 = vld [vmem:[#allocation5 + $0xbf0] sm:$0xff]  ;;  %v464_v63 = vld [vmem:[#allocation5 + $0xbd8] sm:$0xff] }
 0x1b4   :  { %2907 = vmatprep.subr.bf16.mxu0 %v4182_v0  ;;  %3071 = vmatprep.subr.bf16.mxu1 %v4184_v1  ;;  %v468_v0 = vld [vmem:[#allocation5 + $0xbf8] sm:$0xff]  ;;  %v4237_v1 = vcombine.low %v455_v52, %v459_v53  ;;  %v4246_v3 = vcombine.high %v463_v61, %v467_v62  ;;  %v4496_v52 = vld [vmem:[%s5030_s3 + $0x20] sm:$0xff]  }
 0x1b5   :  { %v4248_v4 = vcombine.high %v464_v63, %v468_v0  ;;  %v4247_v10 = vcombine.low %v464_v63, %v468_v0  ;;  %v4502_v63 = vld [vmem:[%s5030_s3 + $0x70] sm:$0xff]  }
 0x1b7   :  { %2908 = vmatpush1.bf16.msra.mxu0 %v4181_v6  ;;  %3072 = vmatpush1.bf16.msra.mxu1 %v4183_v7  ;;  %v475_v6 = vld [vmem:[#allocation5 + $0xc30] sm:$0xff]  ;;  %v472_v7 = vld [vmem:[#allocation5 + $0xc18] sm:$0xff] }
 0x1b8   :  { %2909 = vmatprep.subr.bf16.mxu0 %v4190_v8  ;;  %3073 = vmatprep.subr.bf16.mxu1 %v4192_v9  ;;  %v476_v8 = vld [vmem:[#allocation5 + $0xc38] sm:$0xff]  ;;  %v4245_v9 = vcombine.low %v463_v61, %v467_v62  ;;  %v4254_v11 = vcombine.high %v471_v5, %v475_v6  ;;  %v4253_v14 = vcombine.low %v471_v5, %v475_v6  ;;  %v4501_v62 = vld [vmem:[%s5030_s3 + $0xa8] sm:$0xff]   ;;  %v4506_v5 = vld [vmem:[%s5030_s3 + $0x78] sm:$0xff]  }
 0x1b9   :  { %v4256_v13 = vcombine.high %v472_v7, %v476_v8 }
 0x1bb   :  { %2910 = vmatpush1.bf16.msra.mxu0 %v4189_v57  ;;  %3074 = vmatpush1.bf16.msra.mxu1 %v4191_v15  ;;  %v4255_v57 = vcombine.low %v472_v7, %v476_v8  ;;  %v4478_v15 = vld [vmem:[%s5030_s3 + $0x40] sm:$0xff]   ;;  %v4507_v7 = vld [vmem:[%s5030_s3 + $0xf8] sm:$0xff]  }
 0x1bc   :  { %2911 = vmatprep.subr.bf16.mxu0 %v4198_v16  ;;  %3075 = vmatprep.subr.bf16.mxu1 %v4200_v17  ;;  %v4479_v16 = vld [vmem:[%s5030_s3 + $0xc0] sm:$0xff]   ;;  %v479_v17 = vlaneseq  ;;  %v4508_v8 = vld [vmem:[%s5030_s3 + $0x38] sm:$0xff]  }
 0x1be   :  { %v4805_v18 = vshrl.u32 %v479_v17, 7  ;;  %v4514_v17 = vld [vmem:[%s5030_s3 + $0x148] sm:$0xff]  }
 0x1bf   :  { %2912 = vmatpush1.bf16.msra.mxu0 %v4197_v21  ;;  %3076 = vmatpush1.bf16.msra.mxu1 %v4199_v23  ;;  %v4485_v23 = vld [vmem:[%s5030_s3 + $0x88] sm:$0xff]  }
 0x1c0   :  { %2913 = vmatprep.subr.bf16.mxu0 %v4206_v24  ;;  %3077 = vmatprep.subr.bf16.mxu1 %v4208_v26  ;;  %v485_v21 = vsub.s32 1, %v4805_v18  ;;  %v4486_v24 = vld [vmem:[%s5030_s3 + $0x50] sm:$0xff]   ;;  %v4830_v26 = vld [vmem:[#allocation7] sm:$0xff]  ;;  %v481_v53 = vsub.s32 0, %v4805_v18 }
 0x1c2   :  { %v486_v25 = vrot.slane %v4830_v26, %v485_v21  ;;  %v482_v61 = vrot.slane %v4830_v26, %v481_v53  ;;  %v4519_v21 = vld [vmem:[%s5030_s3 + $0x1d0] sm:$0xff]  }
 0x1c3   :  { %2914 = vmatpush1.bf16.msra.mxu0 %v4205_v29  ;;  %3078 = vmatpush1.bf16.msra.mxu1 %v4207_v30  ;;  %v4490_v30 = vld [vmem:[%s5030_s3 + $0x58] sm:$0xff]  }
 0x1c4   :  { %2915 = vmatprep.subr.bf16.mxu0 %v4214_v31  ;;  %3079 = vmatprep.subr.bf16.mxu1 %v4216_v33  ;;  %v4491_v33 = vld [vmem:[%s5030_s3 + $0xd8] sm:$0xff]  }
 0x1c7   :  { %2916 = vmatpush1.bf16.msra.mxu0 %v4213_v32  ;;  %3080 = vmatpush1.bf16.msra.mxu1 %v4215_v39  ;;  %v4492_v39 = vld [vmem:[%s5030_s3 + $0x18] sm:$0xff]  }
 0x1c8   :  { %2917 = vmatprep.subr.bf16.mxu0 %v4222_v40  ;;  %3081 = vmatprep.subr.bf16.mxu1 %v4224_v41 }
 0x1cb   :  { %2918 = vmatpush1.bf16.msra.mxu0 %v4221_v48  ;;  %3082 = vmatpush1.bf16.msra.mxu1 %v4223_v49  ;;  %v4495_v49 = vld [vmem:[%s5030_s3 + $0xe0] sm:$0xff]  }
 0x1cc   :  { %2919 = vmatprep.subr.bf16.mxu0 %v4230_v50  ;;  %3083 = vmatprep.subr.bf16.mxu1 %v4232_v51 }
 0x1cf   :  { %2920 = vmatpush1.bf16.msra.mxu0 %v4229_v56  ;;  %3084 = vmatpush1.bf16.msra.mxu1 %v4231_v58  ;;  %v4498_v56 = vld [vmem:[%s5030_s3 + $0x68] sm:$0xff]   ;;  %v489_v58 = vsub.s32 2, %v4805_v18 }
 0x1d0   :  { %2921 = vmatprep.subr.bf16.mxu0 %v4238_v59  ;;  %3085 = vmatprep.subr.bf16.mxu1 %v4240_v60  ;;  %v4499_v59 = vld [vmem:[%s5030_s3 + $0xe8] sm:$0xff]  }
 0x1d1   :  { %v4500_v60 = vld [vmem:[%s5030_s3 + $0x28] sm:$0xff]   ;;  %v490_v0 = vrot.slane %v4830_v26, %v489_v58 }
 0x1d3   :  { %2922 = vmatpush1.bf16.msra.mxu0 %v4237_v1  ;;  %3086 = vmatpush1.bf16.msra.mxu1 %v4239_v2  ;;  %v4503_v1 = vld [vmem:[%s5030_s3 + $0xf0] sm:$0xff]  }
 0x1d4   :  { %2923 = vmatprep.subr.bf16.mxu0 %v4246_v3  ;;  %3087 = vmatprep.subr.bf16.mxu1 %v4248_v4  ;;  %v4504_v2 = vld [vmem:[%s5030_s3 + $0x30] sm:$0xff]  }
 0x1d5   :  { %v4505_v4 = vld [vmem:[%s5030_s3 + $0xb0] sm:$0xff]  }
 0x1d7   :  { %2924 = vmatpush1.bf16.msra.mxu0 %v4245_v9  ;;  %3088 = vmatpush1.bf16.msra.mxu1 %v4247_v10  ;;  %v4509_v10 = vld [vmem:[%s5030_s3 + $0xb8] sm:$0xff]  }
 0x1d8   :  { %2934 = vmatprep.subr.bf16.mxu0 %v4254_v11  ;;  %3098 = vmatprep.subr.bf16.mxu1 %v4256_v13  ;;  %v4510_v11 = vld [vmem:[%s5030_s3 + $0x140] sm:$0xff]  }
 0x1da   :  { %2926 = vmatmul.mubr.bf16.vlgmr.msra.gmra.mrb[4].mxu0 %v4770_v34  ;;  %3090 = vmatmul.mubr.bf16.vlgmr.msra.gmra.mrb[4].mxu1 %v4770_v34  ;;  %v4482_v34 = vld [vmem:[%s5030_s3 + $0x48] sm:$0xff]  }
 0x1db   :  { %2935 = vmatpush1.bf16.msra.mxu0 %v4253_v14  ;;  %3099 = vmatpush1.bf16.msra.mxu1 %v4255_v57  ;;  %v4511_v14 = vld [vmem:[%s5030_s3 + $0x1c0] sm:$0xff]  }
 0x1dc   :  { %2966 = vmatprep.mubr.bf16.mxu0 %v4670_v43  ;;  %3130 = vmatprep.mubr.bf16.mxu1 %v4670_v43  ;;  %v4483_v43 = vld [vmem:[%s5030_s3 + $0xc8] sm:$0xff]   ;;  %v4512_v57 = vld [vmem:[%s5030_s3 + $0x100] sm:$0xff]  }
 0x1dd   :  { %4326 = vmatprep.subr.bf16.mxu0 %v4478_v15  ;;  %4348 = vmatprep.subr.bf16.mxu1 %v4479_v16  ;;  %v4513_v16 = vld [vmem:[%s5030_s3 + $0x180] sm:$0xff]  }
 0x1e6   :  { %4259 = vmatmul.mubr.msk.bf16.vlgmr.msra.gmra.mrb[4].mxu0 %vm2479_vm0, %v4776_v47  ;;  %4260 = vmatmul.mubr.msk.bf16.vlgmr.msra.gmra.mrb[4].mxu1 %vm2479_vm0, %v4776_v47  ;;  %v493_v47 = vsub.s32 3, %v4805_v18 }
 0x1e7   :  { %4327 = vmatpush3.bf16.msra.mxu0 %v4480_v12  ;;  %4349 = vmatpush3.bf16.msra.mxu1 %v4481_v19  ;;  %v4515_v19 = vld [vmem:[%s5030_s3 + $0x1c8] sm:$0xff]  }
 0x1e8   :  { %4328 = vmatprep.subr.bf16.mxu0 %v4482_v34  ;;  %4350 = vmatprep.subr.bf16.mxu1 %v4483_v43  ;;  %v494_v29 = vrot.slane %v4830_v26, %v493_v47  ;;  %v4516_v34 = vld [vmem:[%s5030_s3 + $0x108] sm:$0xff]   ;;  %v4522_v47 = vld [vmem:[%s5030_s3 + $0x158] sm:$0xff]  }
 0x1e9   :  { %v4517_v43 = vld [vmem:[%s5030_s3 + $0x188] sm:$0xff]  }
 0x1eb   :  { %4329 = vmatpush3.bf16.msra.mxu0 %v4484_v20  ;;  %4351 = vmatpush3.bf16.msra.mxu1 %v4485_v23  ;;  %v4518_v20 = vld [vmem:[%s5030_s3 + $0x150] sm:$0xff]  }
 0x1ec   :  { %4330 = vmatprep.subr.bf16.mxu0 %v4486_v24  ;;  %4352 = vmatprep.subr.bf16.mxu1 %v4487_v27  ;;  %v4520_v23 = vld [vmem:[%s5030_s3 + $0x110] sm:$0xff]   ;;  %v4523_v27 = vld [vmem:[%s5030_s3 + $0x1d8] sm:$0xff]  }
 0x1ed   :  { %v2640_v31 = vpop.f32.mrb[0].mxu0  ;;  %v2804_v35 = vpop.f32.mrb[0].mxu1  ;;  %v4521_v24 = vld [vmem:[%s5030_s3 + $0x190] sm:$0xff]  }
 0x1ee   :  { %v2642_v36 = vpop.f32.mrb[1].mxu0  ;;  %v2806_v38 = vpop.f32.mrb[1].mxu1  ;;  %v4414_v3 = vadd.f32 %v2640_v31, %v482_v61  ;;  %v4416_v6 = vadd.f32 %v2804_v35, %v490_v0  ;;  %v4529_v31 = vld [vmem:[%s5030_s3 + $0x1a0] sm:$0xff]   ;;  %v4531_v35 = vld [vmem:[%s5030_s3 + $0x1e8] sm:$0xff]  }
 0x1ef   :  { %4331 = vmatpush3.bf16.msra.mxu0 %v4488_v28  ;;  %v4415_v37 = vadd.f32 %v2642_v36, %v486_v25  ;;  %v2644_v32 = vpop.f32.mrb[2].mxu0  ;;  %4353 = vmatpush3.bf16.msra.mxu1 %v4489_v22  ;;  %v4417_v40 = vadd.f32 %v2806_v38, %v494_v29  ;;  %v2808_v41 = vpop.f32.mrb[2].mxu1  ;;  %v4524_v28 = vld [vmem:[%s5030_s3 + $0x118] sm:$0xff]   ;;  %v4526_v22 = vld [vmem:[%s5030_s3 + $0x160] sm:$0xff]   ;;  %v4532_v36 = vld [vmem:[%s5030_s3 + $0x128] sm:$0xff]  }
 0x1f0   :  { %v2645_v42 = vpop.f32.mrb[3].mxu0  ;;  %4332 = vmatprep.subr.bf16.mxu0 %v4490_v30  ;;  %v2809_v48 = vpop.f32.mrb[3].mxu1  ;;  %4354 = vmatprep.subr.bf16.mxu1 %v4491_v33  ;;  %v3139_v9 = vmax.f32 %v4414_v3, 0.0  ;;  %v3141_v13 = vmax.f32 %v4416_v6, 0.0  ;;  %v4525_v25 = vld [vmem:[%s5030_s3 + $0x198] sm:$0xff]   ;;  %v4527_v29 = vld [vmem:[%s5030_s3 + $0x1e0] sm:$0xff]  }
 0x1f1   :  { %v3140_v46 = vmax.f32 %v4415_v37, 0.0  ;;  %v3142_v50 = vmax.f32 %v4417_v40, 0.0  ;;  %v4528_v30 = vld [vmem:[%s5030_s3 + $0x120] sm:$0xff]   ;;  %v4530_v33 = vld [vmem:[%s5030_s3 + $0x168] sm:$0xff]   ;;  %v4534_v38 = vld [vmem:[%s5030_s3 + $0x170] sm:$0xff]   ;;  %v505_v48 = vsub.s32 6, %v4805_v18 }
 0x1f2   :  { %v3147_v15 = vpack.c.bf16 %v3139_v9, %v3139_v9  ;;  %v3149_v12 = vpack.c.bf16 %v3141_v13, %v3141_v13  ;;  %v4533_v37 = vld [vmem:[%s5030_s3 + $0x1a8] sm:$0xff]   ;;  %v4535_v32 = vld [vmem:[%s5030_s3 + $0x1f0] sm:$0xff]   ;;  %v4538_v41 = vld [vmem:[%s5030_s3 + $0x178] sm:$0xff]  }
 0x1f3   :  { %v3148_v51 = vpack.c.bf16 %v3140_v46, %v3140_v46  ;;  %4333 = vmatpush3.bf16.msra.mxu0 %v4492_v39  ;;  %v3150_v54 = vpack.c.bf16 %v3142_v50, %v3142_v50  ;;  %4355 = vmatpush3.bf16.msra.mxu1 %v4493_v44  ;;  %v4536_v39 = vld [vmem:[%s5030_s3 + $0x130] sm:$0xff]   ;;  %v4539_v42 = vld [vmem:[%s5030_s3 + $0x1f8] sm:$0xff]   ;;  %v497_v46 = vsub.s32 4, %v4805_v18  ;;  %v509_v50 = vsub.s32 7, %v4805_v18  ;;  %v4261_v13 = vld [vmem:[#allocation8] ss:$0 sm:$0xff] }
 0x1f4   :  { %4334 = vmatprep.subr.bf16.mxu0 %v4494_v45  ;;  %4356 = vmatprep.subr.bf16.mxu1 %v4495_v49  ;;  %v4537_v40 = vld [vmem:[%s5030_s3 + $0x1b0] sm:$0xff]   ;;  %v4540_v44 = vld [vmem:[%s5030_s3 + $0x138] sm:$0xff]   ;;  %v501_v49 = vsub.s32 5, %v4805_v18 }
 0x1f5   :  { %3706 = vmatprep.mubr.bf16.mxu0 %v3148_v51  ;;  %3746 = vmatprep.mubr.bf16.mxu1 %v3150_v54  ;;  %v4541_v45 = vld [vmem:[%s5030_s3 + $0x1b8] sm:$0xff]   ;;  %v498_v51 = vrot.slane %v4830_v26, %v497_v46  ;;  %v510_v54 = vrot.slane %v4830_v26, %v509_v50  ;;  %s4671_s3 = smov [#allocation10]  }
 0x1f6   :  { %v502_v53 = vrot.slane %v4830_v26, %v501_v49  ;;  %s3854_s26 = sshll.u32 %s4671_s3, 4  ;;  %s3855_s26 = int_to_ptr.vmem [resolvable:$true] %s3854_s26 }
 0x1f7   :  { %4335 = vmatpush3.bf16.msra.mxu0 %v4496_v52  ;;  %4357 = vmatpush3.bf16.msra.mxu1 %v4497_v55  ;;  %v506_v52 = vrot.slane %v4830_v26, %v505_v48  ;;  %s4634_s27 = scalar_lea.vmem %s3855_s26, 128  ;;  %p4639_p5 = scmp.lt.s32.totalorder %s3855_s26, %s3855_s26 }
 0x1f8   :  { %4336 = vmatprep.subr.bf16.mxu0 %v4498_v56  ;;  %4358 = vmatprep.subr.bf16.mxu1 %v4499_v59  ;;  %p4635_p4 = scmp.ne.s32.totalorder %s3855_s26, %s4634_s27  ;;  %p4640_p6 = scmp.lt.s32.totalorder %s4634_s27, %s4634_s27 }
 0x1fa   :  { %p4641_p7 = por %p4640_p6, %p4639_p5 }
 0x1fb   :  { %4337 = vmatpush3.bf16.msra.mxu0 %v4500_v60  ;;  %4359 = vmatpush3.bf16.msra.mxu1 %v4501_v62 }
 0x1fc   :  { %4338 = vmatprep.subr.bf16.mxu0 %v4502_v63  ;;  %4360 = vmatprep.subr.bf16.mxu1 %v4503_v1  ;;  %p4642_p8 = pnand %p4641_p7, %p4635_p4 }
 0x1ff   :  { %4339 = vmatpush3.bf16.msra.mxu0 %v4504_v2  ;;  %4361 = vmatpush3.bf16.msra.mxu1 %v4505_v4 }
 0x200   :  { %4340 = vmatprep.subr.bf16.mxu0 %v4506_v5  ;;  %4362 = vmatprep.subr.bf16.mxu1 %v4507_v7 }
 0x203   :  { %4341 = vmatpush3.bf16.msra.mxu0 %v4508_v8  ;;  %4363 = vmatpush3.bf16.msra.mxu1 %v4509_v10 }
 0x204   :  { %4370 = vmatprep.subr.bf16.mxu0 %v4510_v11  ;;  %4392 = vmatprep.subr.bf16.mxu1 %v4511_v14 }
 0x206   :  { %3707 = vmatmul.mubr.bf16.vlgmr.msra.gmra.mrb[8].mxu0 %v3147_v15  ;;  %3747 = vmatmul.mubr.bf16.vlgmr.msra.gmra.mrb[8].mxu1 %v3149_v12 }
 0x207   :  { %4371 = vmatpush3.bf16.msra.mxu0 %v4512_v57  ;;  %4393 = vmatpush3.bf16.msra.mxu1 %v4513_v16 }
 0x208   :  { %4372 = vmatprep.subr.bf16.mxu0 %v4514_v17  ;;  %4394 = vmatprep.subr.bf16.mxu1 %v4515_v19 }
 0x20b   :  { %4373 = vmatpush3.bf16.msra.mxu0 %v4516_v34  ;;  %4395 = vmatpush3.bf16.msra.mxu1 %v4517_v43 }
 0x20c   :  { %4374 = vmatprep.subr.bf16.mxu0 %v4518_v20  ;;  %4396 = vmatprep.subr.bf16.mxu1 %v4519_v21 }
 0x20f   :  { %4375 = vmatpush3.bf16.msra.mxu0 %v4520_v23  ;;  %4397 = vmatpush3.bf16.msra.mxu1 %v4521_v24 }
 0x210   :  { %4376 = vmatprep.subr.bf16.mxu0 %v4522_v47  ;;  %4398 = vmatprep.subr.bf16.mxu1 %v4523_v27 }
 0x213   :  { %4377 = vmatpush3.bf16.msra.mxu0 %v4524_v28  ;;  %4399 = vmatpush3.bf16.msra.mxu1 %v4525_v25 }
 0x214   :  { %4378 = vmatprep.subr.bf16.mxu0 %v4526_v22  ;;  %4400 = vmatprep.subr.bf16.mxu1 %v4527_v29 }
 0x217   :  { %4379 = vmatpush3.bf16.msra.mxu0 %v4528_v30  ;;  %4401 = vmatpush3.bf16.msra.mxu1 %v4529_v31 }
 0x218   :  { %4380 = vmatprep.subr.bf16.mxu0 %v4530_v33  ;;  %4402 = vmatprep.subr.bf16.mxu1 %v4531_v35 }
 0x21b   :  { %4381 = vmatpush3.bf16.msra.mxu0 %v4532_v36  ;;  %4403 = vmatpush3.bf16.msra.mxu1 %v4533_v37 }
 0x21c   :  { %4382 = vmatprep.subr.bf16.mxu0 %v4534_v38  ;;  %4404 = vmatprep.subr.bf16.mxu1 %v4535_v32 }
 0x21f   :  { %4383 = vmatpush3.bf16.msra.mxu0 %v4536_v39  ;;  %4405 = vmatpush3.bf16.msra.mxu1 %v4537_v40 }
 0x220   :  { %4384 = vmatprep.subr.bf16.mxu0 %v4538_v41  ;;  %4406 = vmatprep.subr.bf16.mxu1 %v4539_v42 }
 0x223   :  { %4385 = vmatpush3.bf16.msra.mxu0 %v4540_v44  ;;  %4407 = vmatpush3.bf16.msra.mxu1 %v4541_v45 }
 0x2b9   :  { %v2968_v55 = vpop.f32.mrb[4].mxu0  ;;  %v3132_v58 = vpop.f32.mrb[4].mxu1 }
 0x2ba   :  { %v4418_v56 = vadd.f32 %v2968_v55, %v498_v51  ;;  %v2970_v59 = vpop.f32.mrb[5].mxu0  ;;  %v4420_v60 = vadd.f32 %v3132_v58, %v506_v52  ;;  %v3134_v62 = vpop.f32.mrb[5].mxu1 }
 0x2bb   :  { %v4419_v61 = vadd.f32 %v2970_v59, %v502_v53  ;;  %v2972_v63 = vpop.f32.mrb[6].mxu0  ;;  %v4421_v1 = vadd.f32 %v3134_v62, %v510_v54  ;;  %v3136_v2 = vpop.f32.mrb[6].mxu1 }
 0x2bc   :  { %v3143_v0 = vmax.f32 %v4418_v56, 0.0  ;;  %v2973_v18 = vpop.f32.mrb[7].mxu0  ;;  %v3145_v3 = vmax.f32 %v4420_v60, 0.0  ;;  %v3137_v5 = vpop.f32.mrb[7].mxu1 }
 0x2bd   :  { %v3144_v4 = vmax.f32 %v4419_v61, 0.0  ;;  %v3146_v6 = vmax.f32 %v4421_v1, 0.0 }
 0x2be   :  { %v3151_v8 = vpack.c.bf16 %v3143_v0, %v3143_v0  ;;  %v3153_v26 = vpack.c.bf16 %v3145_v3, %v3145_v3 }
 0x2bf   :  { %v3152_v7 = vpack.c.bf16 %v3144_v4, %v3144_v4  ;;  %v3154_v9 = vpack.c.bf16 %v3146_v6, %v3146_v6 }
 0x2c1   :  { %3786 = vmatprep.mubr.bf16.mxu0 %v3152_v7  ;;  %3826 = vmatprep.mubr.bf16.mxu1 %v3154_v9 }
 0x2c2   :  { %3787 = vmatmul.mubr.bf16.vlgmr.msra.gmra.mrb[12].mxu0 %v3151_v8  ;;  %3827 = vmatmul.mubr.bf16.vlgmr.msra.gmra.mrb[12].mxu1 %v3153_v26 }
 0x2d9   :  { %v4342_v10 = vpop.f32.mrb[8].mxu0  ;;  %v4364_v11 = vpop.f32.mrb[8].mxu1 }
 0x2da   :  { %v4343_v14 = vpop.f32.mrb[9].mxu0  ;;  %v4365_v15 = vpop.f32.mrb[9].mxu1 }
 0x2db   :  { %v4344_v57 = vadd.f32 %v4343_v14, %v4342_v10  ;;  %v4345_v16 = vpop.f32.mrb[10].mxu0  ;;  %v4366_v17 = vadd.f32 %v4365_v15, %v4364_v11  ;;  %v4367_v12 = vpop.f32.mrb[10].mxu1 }
 0x2dc   :  { %v4346_v19 = vpop.f32.mrb[11].mxu0  ;;  %v4368_v43 = vpop.f32.mrb[11].mxu1 }
 0x2dd   :  { %v3709_v34 = vadd.f32 %v4344_v57, %v4261_v13 }
 0x2df   :  { %v3749_v20 = vadd.f32 %v4366_v17, %v3709_v34 }
 0x395   :  { %v4386_v21 = vpop.f32.mrb[12].mxu0  ;;  %v4408_v23 = vpop.f32.mrb[12].mxu1 }
 0x396   :  { %v4387_v24 = vpop.f32.mrb[13].mxu0  ;;  %v4409_v27 = vpop.f32.mrb[13].mxu1 }
 0x397   :  { %v4388_v47 = vadd.f32 %v4387_v24, %v4386_v21  ;;  %v4389_v28 = vpop.f32.mrb[14].mxu0  ;;  %v4410_v25 = vadd.f32 %v4409_v27, %v4408_v23  ;;  %v4411_v22 = vpop.f32.mrb[14].mxu1 }
 0x398   :  { %v4390_v29 = vpop.f32.mrb[15].mxu0  ;;  %v4412_v31 = vpop.f32.mrb[15].mxu1 }
 0x399   :  { %v3789_v30 = vadd.f32 %v4388_v47, %v3749_v20 }
 0x39b   :  { %v3829_v33 = vadd.f32 %v4410_v25, %v3789_v30 }
 0x39d   :  { %v3835_v35 = vsel %vm3834_vm1, %v3829_v33, -inf }
 0x39e   :  { %3836 = vmax.xlane.f32.xlu0 %v3835_v35 }
 0x42b   :  { %v3837_v36 = vpop.xlane.xlu0 %3836 }
 0x42c   :  { %v3838_v37 = vsub.f32 %v3829_v33, %v3837_v36 }
 0x42e   :  { %v3839_v38 = vmul.f32 1.442695, %v3838_v37 }
 0x430   :  { %4542 = vpow2.f32 %v3839_v38 }
 0x43a   :  { %v4543_v32 = vpop.eup %4542 }
 0x43b   :  { %v3841_v39 = vsel %vm3834_vm1, %v4543_v32, 0.0 }
 0x43c   :  { %3842 = vadd.xlane.f32.xlu0 %v3841_v39 }
 0x4c9   :  { %v3843_v40 = vpop.xlane.xlu0 %3842 }
 0x4ca   :  { %4544 = vlog2.f32 %v3843_v40 }
 0x4d4   :  { %v4545_v41 = vpop.eup %4544 }
 0x4d5   :  { %v3845_v42 = vmul.f32 0.6931472, %v4545_v41 }
 0x4d7   :  { %v3846_v44 = vsub.f32 %v3838_v37, %v3845_v42 }
 0x4d9   :  { %3847 = vst.msk [vmem:[#allocation10] sm:$0xff] %vm3834_vm1, %v3846_v44 }
 0x4da   :  { %4645 = shalt.err (!%p4642_p8)
}
 0x4db   :  { %s4646_s29 = scalar_lea.hbm %s5032_s5, 128 }
 0x4dc   :  { %p4647_p9 = scmp.ne.s32.totalorder %s5032_s5, %s4646_s29  ;;  %p4650_p10 = scmp.lt.u32.totalorder %s4646_s29, %s5032_s5 }
 0x4de   :  { %p4652_p11 = pnand %p4650_p10, %p4647_p9 }
 0x4e0   :  { %4655 = shalt.err (!%p4652_p11)
}
 0x4e1   :  { %3857 = dma.vmem_to_hbm [thread:$0]  %s3855_s26, 128, %s5032_s5, [#allocation4]  }
 0x4e2   :  { %4662 = dma.done.wait [#allocation4], 128  }
 0x4e3   :  { %4663 = vsyncadd [#allocation4], 4294967168 }
 0x4e4   :  { %3861 = vsyncpa [#allocation3], 1 }
 0x4e5   :  { %3862 = vsyncpa [#allocation6], 1 }
 0x4e6   :  { %3863 = vsyncpa [#allocation9], 1 }
 0x4e7   :  { %3864 = vsyncpa [#allocation4], 1 }

</bundles_post_ra>
